<compile_context>
chip_gen: v5e
topology: v5e:2x2
jax: 0.10.0
libtpu: 0.0.40
codegen_flags: <defaults>
</compile_context>

<pallas_src>
import functools

import jax
import jax.numpy as jnp
from jax.experimental import pallas as pl
from jax.experimental.pallas import tpu as pltpu


# ------------------------------ Pallas kernel ------------------------------

def _sab_kernel(x_ref, hh_ref, ww_ref,
                w1_ref, b1_ref, w2_ref, b2_ref,
                wa_ref, ba_ref, wb_ref, bb_ref,
                o_ref, *, H, W):
    """Fused SAB forward for one block of samples, channel-major.

    x_ref  : (C, L)    f32   L = samples_per_block * H * W, lane-dense
    hh_ref : (1, L)    i32   per-lane row index   (h of the output position)
    ww_ref : (1, L)    i32   per-lane column index (w of the output position)
    w1_ref : (C, 9C)   bf16  first 3x3 conv, taps folded: [co, (ky*3+kx)*C+ci]
    w2_ref : (C, 9C)   bf16  second 3x3 conv
    wa_ref : (Cr, C)   bf16  SALayer squeeze 1x1
    wb_ref : (C, Cr)   bf16  SALayer excite 1x1
    b*_ref : (C,1)/(Cr,1) f32 biases (lane-broadcast)
    o_ref  : (C, L)    f32   lane-dense output slab
    """
    C, L = x_ref.shape

    x = x_ref[...].astype(jnp.float32)                      # (C, L)

    # Border masks on the output lane position, shared by both 3x3 convs.
    hh = jnp.broadcast_to(hh_ref[...], (C, L))              # i32 (C, L)
    ww = jnp.broadcast_to(ww_ref[...], (C, L))
    row_ok = {-1: hh >= 1, 0: None, 1: hh <= H - 2}
    col_ok = {-1: ww >= 1, 0: None, 1: ww <= W - 2}

    def conv3x3(inp_f32, w_ref_, b_ref_):
        # Nine taps = lane rotations of the flattened (C, H*W) activation;
        # out-of-image reads (which would wrap across rows/samples) are
        # zeroed by the border masks, reproducing zero padding.
        taps = []
        for ky in range(3):
            for kx in range(3):
                dy, dx = ky - 1, kx - 1
                off = dy * W + dx                            # lane offset
                t = inp_f32 if off == 0 else pltpu.roll(inp_f32,
                                                        (-off) % L, axis=1)
                m = row_ok[dy]
                mc = col_ok[dx]
                if m is None:
                    m = mc
                elif mc is not None:
                    m = jnp.logical_and(m, mc)
                if m is not None:
                    t = jnp.where(m, t, 0.0)
                taps.append(t.astype(jnp.bfloat16))          # bf16 patch rows
        patch = jnp.concatenate(taps, axis=0)                # (9C, L) bf16
        acc = jnp.dot(w_ref_[...], patch,
                      preferred_element_type=jnp.float32)    # (C, L) f32
        return acc + b_ref_[...]

    # body: conv3x3 -> ReLU -> conv3x3
    c1 = jnp.maximum(conv3x3(x, w1_ref, b1_ref), 0.0)
    c2 = conv3x3(c1, w2_ref, b2_ref)

    # SALayer: 1x1 -> ReLU -> 1x1 -> sigmoid, gate c2
    y1 = jnp.maximum(
        jnp.dot(wa_ref[...], c2.astype(jnp.bfloat16),
                preferred_element_type=jnp.float32) + ba_ref[...], 0.0)
    y2 = jax.nn.sigmoid(
        jnp.dot(wb_ref[...], y1.astype(jnp.bfloat16),
                preferred_element_type=jnp.float32) + bb_ref[...])
    sp = c2 * y2

    # SAB: out = sigmoid(sp) * x   (lane-dense unmasked store: L % 128 == 0)
    o_ref[...] = (jax.nn.sigmoid(sp) * x).astype(o_ref.dtype)


# --------------------------------- wrapper ---------------------------------

def sab_forward(x_nchw, params, *, samples_per_block=1):
    """SAB.forward; input/output are NCHW to match the PyTorch module."""
    N, C, H, W = x_nchw.shape
    Cr = params["wa"].shape[-1]
    bpb = samples_per_block
    assert N % bpb == 0, "batch must be divisible by samples_per_block"
    G = N // bpb
    L = bpb * H * W
    # Note: L (= bpb*H*W) a multiple of 128 gives unmasked lane-dense vector
    # loads/stores; other sizes still work but fall back to masked partials.

    # NCHW -> (G, C, bpb*H*W) channel-major slabs (pure reshape when bpb == 1).
    x = x_nchw.reshape(G, bpb, C, H * W)
    x = jnp.transpose(x, (0, 2, 1, 3)).reshape(G, C, L)

    # Fold 3x3 taps so each conv is one K=9C matmul in channel-major form:
    # Wf[co, (ky*3+kx)*C + ci] = w_hwio[ky, kx, ci, co]; bf16 for the MXU.
    w1 = jnp.transpose(params["w1"], (3, 0, 1, 2)).reshape(C, 9 * C).astype(jnp.bfloat16)
    w2 = jnp.transpose(params["w2"], (3, 0, 1, 2)).reshape(C, 9 * C).astype(jnp.bfloat16)
    wa = jnp.transpose(params["wa"]).astype(jnp.bfloat16)            # (Cr, C)
    wb = jnp.transpose(params["wb"]).astype(jnp.bfloat16)            # (C, Cr)
    b1 = params["b1"].reshape(C, 1).astype(jnp.float32)
    b2 = params["b2"].reshape(C, 1).astype(jnp.float32)
    ba = params["ba"].reshape(Cr, 1).astype(jnp.float32)
    bb = params["bb"].reshape(C, 1).astype(jnp.float32)

    # Per-lane (h, w) indices for the conv border masks (computed once here so
    # the kernel needs no integer div/mod).
    hw_idx = jnp.arange(L, dtype=jnp.int32) % (H * W)
    hh = (hw_idx // W).reshape(1, L)
    ww = (hw_idx % W).reshape(1, L)

    def const(shape):
        # Whole array resident in VMEM; same block every grid step.
        return pl.BlockSpec(shape, lambda i: (0,) * len(shape))

    out3 = pl.pallas_call(
        functools.partial(_sab_kernel, H=H, W=W),
        out_shape=jax.ShapeDtypeStruct((G, C, L), x_nchw.dtype),
        grid=(G,),
        in_specs=[
            pl.BlockSpec((None, C, L), lambda i: (i, 0, 0)),   # x slab
            const((1, L)), const((1, L)),                      # hh, ww
            const((C, 9 * C)), const((C, 1)),                  # w1, b1
            const((C, 9 * C)), const((C, 1)),                  # w2, b2
            const((Cr, C)), const((Cr, 1)),                    # wa, ba
            const((C, Cr)), const((C, 1)),                     # wb, bb
        ],
        out_specs=pl.BlockSpec((None, C, L), lambda i: (i, 0, 0)),
        compiler_params=pltpu.CompilerParams(
            dimension_semantics=("parallel",),
            vmem_limit_bytes=16 * 1024 * 1024,
        ),
    )(x, hh, ww, w1, b1, w2, b2, wa, ba, wb, bb)

    out = out3.reshape(G, C, bpb, H, W)
    out = jnp.transpose(out, (0, 2, 1, 3, 4)).reshape(N, C, H, W)
    return out


# --------------------------- parameters & reference -------------------------

def make_params(key, n_feat, reduction):
    ks = jax.random.split(key, 8)
    Cr = n_feat // reduction

    def conv_init(kw, kb, cin, cout, ksz):
        bound = 1.0 / jnp.sqrt(jnp.float32(cin * ksz * ksz))
        wshape = (ksz, ksz, cin, cout) if ksz > 1 else (cin, cout)
        w = jax.random.uniform(kw, wshape, jnp.float32, -bound, bound)
        b = jax.random.uniform(kb, (cout,), jnp.float32, -bound, bound)
        return w, b

    p = {}
    p["w1"], p["b1"] = conv_init(ks[0], ks[1], n_feat, n_feat, 3)  # (3,3,C,C) HWIO
    p["w2"], p["b2"] = conv_init(ks[2], ks[3], n_feat, n_feat, 3)
    p["wa"], p["ba"] = conv_init(ks[4], ks[5], n_feat, Cr, 1)      # (C, Cr)
    p["wb"], p["bb"] = conv_init(ks[6], ks[7], Cr, n_feat, 1)      # (Cr, C)
    return p


def sab_reference(x_nchw, params):
    """Pure-JAX (f32) reference mirroring the PyTorch SAB forward."""
    def conv3x3(v, w, b):
        out = jax.lax.conv_general_dilated(
            v, w, window_strides=(1, 1), padding=((1, 1), (1, 1)),
            dimension_numbers=("NCHW", "HWIO", "NCHW"))
        return out + b[None, :, None, None]

    def conv1x1(v, w, b):
        return jnp.einsum("nchw,cd->ndhw", v, w) + b[None, :, None, None]

    c1 = jax.nn.relu(conv3x3(x_nchw, params["w1"], params["b1"]))
    c2 = conv3x3(c1, params["w2"], params["b2"])
    y1 = jax.nn.relu(conv1x1(c2, params["wa"], params["ba"]))
    y2 = jax.nn.sigmoid(conv1x1(y1, params["wb"], params["bb"]))
    sp = c2 * y2
    return jax.nn.sigmoid(sp) * x_nchw


# ----------------------------------- main -----------------------------------

if __name__ == "__main__":
    key = jax.random.PRNGKey(0)
    k_x, k_p = jax.random.split(key)

    n_feat, reduction = 16, 4
    N, H, W = 2, 16, 16

    x = jax.random.normal(k_x, (N, n_feat, H, W), jnp.float32)     # NCHW
    params = make_params(k_p, n_feat, reduction)

    out = jax.jit(sab_forward)(x, params)
    out = jax.block_until_ready(out)

    assert out.shape == (N, n_feat, H, W), out.shape
    assert bool(jnp.all(jnp.isfinite(out))), "non-finite output"

    # Sanity check against an f32 JAX reference (kernel uses bf16 MXU inputs,
    # so tolerance is loose but still catches any structural bug).
    ref = sab_reference(x, params)
    max_err = float(jnp.max(jnp.abs(out - ref)))
    assert max_err < 0.1, f"mismatch vs reference: max_err={max_err}"

    print("KERNEL_OK")
</pallas_src>

<mosaic_0001>
module attributes {stable_mosaic.version = 11 : i64} {
  func.func @_sab_kernel(%arg0: i32, %arg1: memref<1x16x256xf32, #tpu.memory_space<vmem>>, %arg2: memref<1x256xi32, #tpu.memory_space<vmem>>, %arg3: memref<1x256xi32, #tpu.memory_space<vmem>>, %arg4: memref<16x144xbf16, #tpu.memory_space<vmem>>, %arg5: memref<16x1xf32, #tpu.memory_space<vmem>>, %arg6: memref<16x144xbf16, #tpu.memory_space<vmem>>, %arg7: memref<16x1xf32, #tpu.memory_space<vmem>>, %arg8: memref<4x16xbf16, #tpu.memory_space<vmem>>, %arg9: memref<4x1xf32, #tpu.memory_space<vmem>>, %arg10: memref<16x4xbf16, #tpu.memory_space<vmem>>, %arg11: memref<16x1xf32, #tpu.memory_space<vmem>>, %arg12: memref<1x16x256xf32, #tpu.memory_space<vmem>>) attributes {dimension_semantics = [#tpu.dimension_semantics<parallel>], iteration_bounds = array<i64: 2>, scalar_prefetch = 0 : i64, scratch_operands = 0 : i64, tpu.core_type = #tpu.core_type<tc>, window_params = [{transform_indices = @transform_0, window_bounds = array<i64: 1, 16, 256>}, {pipeline_mode = #tpu.pipeline_mode<synchronous>, transform_indices = @transform_1, window_bounds = array<i64: 1, 256>}, {pipeline_mode = #tpu.pipeline_mode<synchronous>, transform_indices = @transform_2, window_bounds = array<i64: 1, 256>}, {pipeline_mode = #tpu.pipeline_mode<synchronous>, transform_indices = @transform_3, window_bounds = array<i64: 16, 144>}, {pipeline_mode = #tpu.pipeline_mode<synchronous>, transform_indices = @transform_4, window_bounds = array<i64: 16, 1>}, {pipeline_mode = #tpu.pipeline_mode<synchronous>, transform_indices = @transform_5, window_bounds = array<i64: 16, 144>}, {pipeline_mode = #tpu.pipeline_mode<synchronous>, transform_indices = @transform_6, window_bounds = array<i64: 16, 1>}, {pipeline_mode = #tpu.pipeline_mode<synchronous>, transform_indices = @transform_7, window_bounds = array<i64: 4, 16>}, {pipeline_mode = #tpu.pipeline_mode<synchronous>, transform_indices = @transform_8, window_bounds = array<i64: 4, 1>}, {pipeline_mode = #tpu.pipeline_mode<synchronous>, transform_indices = @transform_9, window_bounds = array<i64: 16, 4>}, {pipeline_mode = #tpu.pipeline_mode<synchronous>, transform_indices = @transform_10, window_bounds = array<i64: 16, 1>}, {transform_indices = @transform_11, window_bounds = array<i64: 1, 16, 256>}]} {
    %c0 = arith.constant 0 : index
    %c0_0 = arith.constant 0 : index
    %c0_1 = arith.constant 0 : index
    %0 = vector.load %arg1[%c0, %c0_0, %c0_1] : memref<1x16x256xf32, #tpu.memory_space<vmem>>, vector<1x16x256xf32>
    %1 = vector.shape_cast %0 : vector<1x16x256xf32> to vector<16x256xf32>
    %c0_2 = arith.constant 0 : index
    %c0_3 = arith.constant 0 : index
    %2 = vector.load %arg2[%c0_2, %c0_3] : memref<1x256xi32, #tpu.memory_space<vmem>>, vector<1x256xi32>
    %3 = vector.shape_cast %2 : vector<1x256xi32> to vector<1x256xi32>
    %4 = vector.broadcast %3 : vector<1x256xi32> to vector<16x256xi32>
    %c0_4 = arith.constant 0 : index
    %c0_5 = arith.constant 0 : index
    %5 = vector.load %arg3[%c0_4, %c0_5] : memref<1x256xi32, #tpu.memory_space<vmem>>, vector<1x256xi32>
    %6 = vector.shape_cast %5 : vector<1x256xi32> to vector<1x256xi32>
    %7 = vector.broadcast %6 : vector<1x256xi32> to vector<16x256xi32>
    %c1_i32 = arith.constant 1 : i32
    %8 = vector.broadcast %c1_i32 : i32 to vector<16x256xi32>
    %9 = arith.cmpi sge, %4, %8 : vector<16x256xi32>
    %c14_i32 = arith.constant 14 : i32
    %10 = vector.broadcast %c14_i32 : i32 to vector<16x256xi32>
    %11 = arith.cmpi sle, %4, %10 : vector<16x256xi32>
    %c1_i32_6 = arith.constant 1 : i32
    %12 = vector.broadcast %c1_i32_6 : i32 to vector<16x256xi32>
    %13 = arith.cmpi sge, %7, %12 : vector<16x256xi32>
    %c14_i32_7 = arith.constant 14 : i32
    %14 = vector.broadcast %c14_i32_7 : i32 to vector<16x256xi32>
    %15 = arith.cmpi sle, %7, %14 : vector<16x256xi32>
    %c17_i32 = arith.constant 17 : i32
    %16 = tpu.dynamic_rotate %1 by %c17_i32 dim 1 : vector<16x256xf32>, i32 -> vector<16x256xf32>
    %17 = arith.andi %9, %13 : vector<16x256xi1>
    %cst = arith.constant 0.000000e+00 : f32
    %18 = vector.broadcast %cst : f32 to vector<16x256xf32>
    %19 = arith.select %17, %16, %18 : vector<16x256xi1>, vector<16x256xf32>
    %20 = arith.truncf %19 : vector<16x256xf32> to vector<16x256xbf16>
    %c16_i32 = arith.constant 16 : i32
    %21 = tpu.dynamic_rotate %1 by %c16_i32 dim 1 : vector<16x256xf32>, i32 -> vector<16x256xf32>
    %cst_8 = arith.constant 0.000000e+00 : f32
    %22 = vector.broadcast %cst_8 : f32 to vector<16x256xf32>
    %23 = arith.select %9, %21, %22 : vector<16x256xi1>, vector<16x256xf32>
    %24 = arith.truncf %23 : vector<16x256xf32> to vector<16x256xbf16>
    %c15_i32 = arith.constant 15 : i32
    %25 = tpu.dynamic_rotate %1 by %c15_i32 dim 1 : vector<16x256xf32>, i32 -> vector<16x256xf32>
    %26 = arith.andi %9, %15 : vector<16x256xi1>
    %cst_9 = arith.constant 0.000000e+00 : f32
    %27 = vector.broadcast %cst_9 : f32 to vector<16x256xf32>
    %28 = arith.select %26, %25, %27 : vector<16x256xi1>, vector<16x256xf32>
    %29 = arith.truncf %28 : vector<16x256xf32> to vector<16x256xbf16>
    %c1_i32_10 = arith.constant 1 : i32
    %30 = tpu.dynamic_rotate %1 by %c1_i32_10 dim 1 : vector<16x256xf32>, i32 -> vector<16x256xf32>
    %cst_11 = arith.constant 0.000000e+00 : f32
    %31 = vector.broadcast %cst_11 : f32 to vector<16x256xf32>
    %32 = arith.select %13, %30, %31 : vector<16x256xi1>, vector<16x256xf32>
    %33 = arith.truncf %32 : vector<16x256xf32> to vector<16x256xbf16>
    %34 = arith.truncf %1 : vector<16x256xf32> to vector<16x256xbf16>
    %c255_i32 = arith.constant 255 : i32
    %35 = tpu.dynamic_rotate %1 by %c255_i32 dim 1 : vector<16x256xf32>, i32 -> vector<16x256xf32>
    %cst_12 = arith.constant 0.000000e+00 : f32
    %36 = vector.broadcast %cst_12 : f32 to vector<16x256xf32>
    %37 = arith.select %15, %35, %36 : vector<16x256xi1>, vector<16x256xf32>
    %38 = arith.truncf %37 : vector<16x256xf32> to vector<16x256xbf16>
    %c241_i32 = arith.constant 241 : i32
    %39 = tpu.dynamic_rotate %1 by %c241_i32 dim 1 : vector<16x256xf32>, i32 -> vector<16x256xf32>
    %40 = arith.andi %11, %13 : vector<16x256xi1>
    %cst_13 = arith.constant 0.000000e+00 : f32
    %41 = vector.broadcast %cst_13 : f32 to vector<16x256xf32>
    %42 = arith.select %40, %39, %41 : vector<16x256xi1>, vector<16x256xf32>
    %43 = arith.truncf %42 : vector<16x256xf32> to vector<16x256xbf16>
    %c240_i32 = arith.constant 240 : i32
    %44 = tpu.dynamic_rotate %1 by %c240_i32 dim 1 : vector<16x256xf32>, i32 -> vector<16x256xf32>
    %cst_14 = arith.constant 0.000000e+00 : f32
    %45 = vector.broadcast %cst_14 : f32 to vector<16x256xf32>
    %46 = arith.select %11, %44, %45 : vector<16x256xi1>, vector<16x256xf32>
    %47 = arith.truncf %46 : vector<16x256xf32> to vector<16x256xbf16>
    %c239_i32 = arith.constant 239 : i32
    %48 = tpu.dynamic_rotate %1 by %c239_i32 dim 1 : vector<16x256xf32>, i32 -> vector<16x256xf32>
    %49 = arith.andi %11, %15 : vector<16x256xi1>
    %cst_15 = arith.constant 0.000000e+00 : f32
    %50 = vector.broadcast %cst_15 : f32 to vector<16x256xf32>
    %51 = arith.select %49, %48, %50 : vector<16x256xi1>, vector<16x256xf32>
    %52 = arith.truncf %51 : vector<16x256xf32> to vector<16x256xbf16>
    %53 = tpu.concatenate %20, %24, %29, %33, %34, %38, %43, %47, %52 in 0 : vector<16x256xbf16>, vector<16x256xbf16>, vector<16x256xbf16>, vector<16x256xbf16>, vector<16x256xbf16>, vector<16x256xbf16>, vector<16x256xbf16>, vector<16x256xbf16>, vector<16x256xbf16> -> vector<144x256xbf16>
    %c0_16 = arith.constant 0 : index
    %c0_17 = arith.constant 0 : index
    %54 = vector.load %arg4[%c0_16, %c0_17] : memref<16x144xbf16, #tpu.memory_space<vmem>>, vector<16x144xbf16>
    %cst_18 = arith.constant dense<0.000000e+00> : vector<16x256xf32>
    %55 = tpu.matmul %54, %53, %cst_18 {dimension_numbers = #tpu.dot_dimension_numbers<[1], [0], [0], [1], [0, 0, 1, 1], [], []>} : vector<16x144xbf16>, vector<144x256xbf16>, vector<16x256xf32> -> vector<16x256xf32>
    %c0_19 = arith.constant 0 : index
    %c0_20 = arith.constant 0 : index
    %56 = vector.load %arg5[%c0_19, %c0_20] : memref<16x1xf32, #tpu.memory_space<vmem>>, vector<16x1xf32>
    %57 = vector.broadcast %56 : vector<16x1xf32> to vector<16x256xf32>
    %58 = arith.addf %55, %57 : vector<16x256xf32>
    %cst_21 = arith.constant 0.000000e+00 : f32
    %59 = vector.broadcast %cst_21 : f32 to vector<16x256xf32>
    %60 = arith.maximumf %58, %59 : vector<16x256xf32>
    %c17_i32_22 = arith.constant 17 : i32
    %61 = tpu.dynamic_rotate %60 by %c17_i32_22 dim 1 : vector<16x256xf32>, i32 -> vector<16x256xf32>
    %62 = arith.andi %9, %13 : vector<16x256xi1>
    %cst_23 = arith.constant 0.000000e+00 : f32
    %63 = vector.broadcast %cst_23 : f32 to vector<16x256xf32>
    %64 = arith.select %62, %61, %63 : vector<16x256xi1>, vector<16x256xf32>
    %65 = arith.truncf %64 : vector<16x256xf32> to vector<16x256xbf16>
    %c16_i32_24 = arith.constant 16 : i32
    %66 = tpu.dynamic_rotate %60 by %c16_i32_24 dim 1 : vector<16x256xf32>, i32 -> vector<16x256xf32>
    %cst_25 = arith.constant 0.000000e+00 : f32
    %67 = vector.broadcast %cst_25 : f32 to vector<16x256xf32>
    %68 = arith.select %9, %66, %67 : vector<16x256xi1>, vector<16x256xf32>
    %69 = arith.truncf %68 : vector<16x256xf32> to vector<16x256xbf16>
    %c15_i32_26 = arith.constant 15 : i32
    %70 = tpu.dynamic_rotate %60 by %c15_i32_26 dim 1 : vector<16x256xf32>, i32 -> vector<16x256xf32>
    %71 = arith.andi %9, %15 : vector<16x256xi1>
    %cst_27 = arith.constant 0.000000e+00 : f32
    %72 = vector.broadcast %cst_27 : f32 to vector<16x256xf32>
    %73 = arith.select %71, %70, %72 : vector<16x256xi1>, vector<16x256xf32>
    %74 = arith.truncf %73 : vector<16x256xf32> to vector<16x256xbf16>
    %c1_i32_28 = arith.constant 1 : i32
    %75 = tpu.dynamic_rotate %60 by %c1_i32_28 dim 1 : vector<16x256xf32>, i32 -> vector<16x256xf32>
    %cst_29 = arith.constant 0.000000e+00 : f32
    %76 = vector.broadcast %cst_29 : f32 to vector<16x256xf32>
    %77 = arith.select %13, %75, %76 : vector<16x256xi1>, vector<16x256xf32>
    %78 = arith.truncf %77 : vector<16x256xf32> to vector<16x256xbf16>
    %79 = arith.truncf %60 : vector<16x256xf32> to vector<16x256xbf16>
    %c255_i32_30 = arith.constant 255 : i32
    %80 = tpu.dynamic_rotate %60 by %c255_i32_30 dim 1 : vector<16x256xf32>, i32 -> vector<16x256xf32>
    %cst_31 = arith.constant 0.000000e+00 : f32
    %81 = vector.broadcast %cst_31 : f32 to vector<16x256xf32>
    %82 = arith.select %15, %80, %81 : vector<16x256xi1>, vector<16x256xf32>
    %83 = arith.truncf %82 : vector<16x256xf32> to vector<16x256xbf16>
    %c241_i32_32 = arith.constant 241 : i32
    %84 = tpu.dynamic_rotate %60 by %c241_i32_32 dim 1 : vector<16x256xf32>, i32 -> vector<16x256xf32>
    %85 = arith.andi %11, %13 : vector<16x256xi1>
    %cst_33 = arith.constant 0.000000e+00 : f32
    %86 = vector.broadcast %cst_33 : f32 to vector<16x256xf32>
    %87 = arith.select %85, %84, %86 : vector<16x256xi1>, vector<16x256xf32>
    %88 = arith.truncf %87 : vector<16x256xf32> to vector<16x256xbf16>
    %c240_i32_34 = arith.constant 240 : i32
    %89 = tpu.dynamic_rotate %60 by %c240_i32_34 dim 1 : vector<16x256xf32>, i32 -> vector<16x256xf32>
    %cst_35 = arith.constant 0.000000e+00 : f32
    %90 = vector.broadcast %cst_35 : f32 to vector<16x256xf32>
    %91 = arith.select %11, %89, %90 : vector<16x256xi1>, vector<16x256xf32>
    %92 = arith.truncf %91 : vector<16x256xf32> to vector<16x256xbf16>
    %c239_i32_36 = arith.constant 239 : i32
    %93 = tpu.dynamic_rotate %60 by %c239_i32_36 dim 1 : vector<16x256xf32>, i32 -> vector<16x256xf32>
    %94 = arith.andi %11, %15 : vector<16x256xi1>
    %cst_37 = arith.constant 0.000000e+00 : f32
    %95 = vector.broadcast %cst_37 : f32 to vector<16x256xf32>
    %96 = arith.select %94, %93, %95 : vector<16x256xi1>, vector<16x256xf32>
    %97 = arith.truncf %96 : vector<16x256xf32> to vector<16x256xbf16>
    %98 = tpu.concatenate %65, %69, %74, %78, %79, %83, %88, %92, %97 in 0 : vector<16x256xbf16>, vector<16x256xbf16>, vector<16x256xbf16>, vector<16x256xbf16>, vector<16x256xbf16>, vector<16x256xbf16>, vector<16x256xbf16>, vector<16x256xbf16>, vector<16x256xbf16> -> vector<144x256xbf16>
    %c0_38 = arith.constant 0 : index
    %c0_39 = arith.constant 0 : index
    %99 = vector.load %arg6[%c0_38, %c0_39] : memref<16x144xbf16, #tpu.memory_space<vmem>>, vector<16x144xbf16>
    %cst_40 = arith.constant dense<0.000000e+00> : vector<16x256xf32>
    %100 = tpu.matmul %99, %98, %cst_40 {dimension_numbers = #tpu.dot_dimension_numbers<[1], [0], [0], [1], [0, 0, 1, 1], [], []>} : vector<16x144xbf16>, vector<144x256xbf16>, vector<16x256xf32> -> vector<16x256xf32>
    %c0_41 = arith.constant 0 : index
    %c0_42 = arith.constant 0 : index
    %101 = vector.load %arg7[%c0_41, %c0_42] : memref<16x1xf32, #tpu.memory_space<vmem>>, vector<16x1xf32>
    %102 = vector.broadcast %101 : vector<16x1xf32> to vector<16x256xf32>
    %103 = arith.addf %100, %102 : vector<16x256xf32>
    %c0_43 = arith.constant 0 : index
    %c0_44 = arith.constant 0 : index
    %104 = vector.load %arg8[%c0_43, %c0_44] : memref<4x16xbf16, #tpu.memory_space<vmem>>, vector<4x16xbf16>
    %105 = arith.truncf %103 : vector<16x256xf32> to vector<16x256xbf16>
    %cst_45 = arith.constant dense<0.000000e+00> : vector<4x256xf32>
    %106 = tpu.matmul %104, %105, %cst_45 {dimension_numbers = #tpu.dot_dimension_numbers<[1], [0], [0], [1], [0, 0, 1, 1], [], []>} : vector<4x16xbf16>, vector<16x256xbf16>, vector<4x256xf32> -> vector<4x256xf32>
    %c0_46 = arith.constant 0 : index
    %c0_47 = arith.constant 0 : index
    %107 = vector.load %arg9[%c0_46, %c0_47] : memref<4x1xf32, #tpu.memory_space<vmem>>, vector<4x1xf32>
    %108 = vector.broadcast %107 : vector<4x1xf32> to vector<4x256xf32>
    %109 = arith.addf %106, %108 : vector<4x256xf32>
    %cst_48 = arith.constant 0.000000e+00 : f32
    %110 = vector.broadcast %cst_48 : f32 to vector<4x256xf32>
    %111 = arith.maximumf %109, %110 : vector<4x256xf32>
    %c0_49 = arith.constant 0 : index
    %c0_50 = arith.constant 0 : index
    %112 = vector.load %arg10[%c0_49, %c0_50] : memref<16x4xbf16, #tpu.memory_space<vmem>>, vector<16x4xbf16>
    %113 = arith.truncf %111 : vector<4x256xf32> to vector<4x256xbf16>
    %cst_51 = arith.constant dense<0.000000e+00> : vector<16x256xf32>
    %114 = tpu.matmul %112, %113, %cst_51 {dimension_numbers = #tpu.dot_dimension_numbers<[1], [0], [0], [1], [0, 0, 1, 1], [], []>} : vector<16x4xbf16>, vector<4x256xbf16>, vector<16x256xf32> -> vector<16x256xf32>
    %c0_52 = arith.constant 0 : index
    %c0_53 = arith.constant 0 : index
    %115 = vector.load %arg11[%c0_52, %c0_53] : memref<16x1xf32, #tpu.memory_space<vmem>>, vector<16x1xf32>
    %116 = vector.broadcast %115 : vector<16x1xf32> to vector<16x256xf32>
    %117 = arith.addf %114, %116 : vector<16x256xf32>
    %118 = arith.negf %117 : vector<16x256xf32>
    %119 = math.exp %118 : vector<16x256xf32>
    %cst_54 = arith.constant 1.000000e+00 : f32
    %120 = vector.broadcast %cst_54 : f32 to vector<16x256xf32>
    %121 = arith.addf %120, %119 : vector<16x256xf32>
    %122 = arith.divf %120, %121 : vector<16x256xf32>
    %123 = arith.mulf %103, %122 : vector<16x256xf32>
    %124 = arith.negf %123 : vector<16x256xf32>
    %125 = math.exp %124 : vector<16x256xf32>
    %cst_55 = arith.constant 1.000000e+00 : f32
    %126 = vector.broadcast %cst_55 : f32 to vector<16x256xf32>
    %127 = arith.addf %126, %125 : vector<16x256xf32>
    %128 = arith.divf %126, %127 : vector<16x256xf32>
    %129 = arith.mulf %128, %1 : vector<16x256xf32>
    %c0_56 = arith.constant 0 : index
    %c0_57 = arith.constant 0 : index
    %c0_58 = arith.constant 0 : index
    %130 = vector.load %arg12[%c0_56, %c0_57, %c0_58] : memref<1x16x256xf32, #tpu.memory_space<vmem>>, vector<1x16x256xf32>
    %131 = vector.shape_cast %130 : vector<1x16x256xf32> to vector<16x256xf32>
    %132 = vector.shape_cast %129 : vector<16x256xf32> to vector<1x16x256xf32>
    tpu.vector_store %arg12[%c0_56, %c0_57, %c0_58], %132 {strides = array<i32>} : memref<1x16x256xf32, #tpu.memory_space<vmem>>, vector<1x16x256xf32>,
    return
  }
  func.func @transform_0(%arg0: i32) -> (i32, i32, i32) {
    %c0_i32 = arith.constant 0 : i32
    %c0_i32_0 = arith.constant 0 : i32
    %c0_i32_1 = arith.constant 0 : i32
    return %arg0, %c0_i32, %c0_i32_0 : i32, i32, i32
  }
  func.func @transform_1(%arg0: i32) -> (i32, i32) {
    %c0_i32 = arith.constant 0 : i32
    %c0_i32_0 = arith.constant 0 : i32
    %c0_i32_1 = arith.constant 0 : i32
    return %c0_i32, %c0_i32_0 : i32, i32
  }
  func.func @transform_2(%arg0: i32) -> (i32, i32) {
    %c0_i32 = arith.constant 0 : i32
    %c0_i32_0 = arith.constant 0 : i32
    %c0_i32_1 = arith.constant 0 : i32
    return %c0_i32, %c0_i32_0 : i32, i32
  }
  func.func @transform_3(%arg0: i32) -> (i32, i32) {
    %c0_i32 = arith.constant 0 : i32
    %c0_i32_0 = arith.constant 0 : i32
    %c0_i32_1 = arith.constant 0 : i32
    return %c0_i32, %c0_i32_0 : i32, i32
  }
  func.func @transform_4(%arg0: i32) -> (i32, i32) {
    %c0_i32 = arith.constant 0 : i32
    %c0_i32_0 = arith.constant 0 : i32
    %c0_i32_1 = arith.constant 0 : i32
    return %c0_i32, %c0_i32_0 : i32, i32
  }
  func.func @transform_5(%arg0: i32) -> (i32, i32) {
    %c0_i32 = arith.constant 0 : i32
    %c0_i32_0 = arith.constant 0 : i32
    %c0_i32_1 = arith.constant 0 : i32
    return %c0_i32, %c0_i32_0 : i32, i32
  }
  func.func @transform_6(%arg0: i32) -> (i32, i32) {
    %c0_i32 = arith.constant 0 : i32
    %c0_i32_0 = arith.constant 0 : i32
    %c0_i32_1 = arith.constant 0 : i32
    return %c0_i32, %c0_i32_0 : i32, i32
  }
  func.func @transform_7(%arg0: i32) -> (i32, i32) {
    %c0_i32 = arith.constant 0 : i32
    %c0_i32_0 = arith.constant 0 : i32
    %c0_i32_1 = arith.constant 0 : i32
    return %c0_i32, %c0_i32_0 : i32, i32
  }
  func.func @transform_8(%arg0: i32) -> (i32, i32) {
    %c0_i32 = arith.constant 0 : i32
    %c0_i32_0 = arith.constant 0 : i32
    %c0_i32_1 = arith.constant 0 : i32
    return %c0_i32, %c0_i32_0 : i32, i32
  }
  func.func @transform_9(%arg0: i32) -> (i32, i32) {
    %c0_i32 = arith.constant 0 : i32
    %c0_i32_0 = arith.constant 0 : i32
    %c0_i32_1 = arith.constant 0 : i32
    return %c0_i32, %c0_i32_0 : i32, i32
  }
  func.func @transform_10(%arg0: i32) -> (i32, i32) {
    %c0_i32 = arith.constant 0 : i32
    %c0_i32_0 = arith.constant 0 : i32
    %c0_i32_1 = arith.constant 0 : i32
    return %c0_i32, %c0_i32_0 : i32, i32
  }
  func.func @transform_11(%arg0: i32) -> (i32, i32, i32) {
    %c0_i32 = arith.constant 0 : i32
    %c0_i32_0 = arith.constant 0 : i32
    %c0_i32_1 = arith.constant 0 : i32
    return %arg0, %c0_i32, %c0_i32_0 : i32, i32, i32
  }
}

</mosaic_0001>

<bundles_post_ra>
// kernel: sab_forward.1
= control target key start
LH: loop header
LB: loop body
LE: loop exit
PB: predicated region body
PF: predicated region fallthrough
CT: control target
= control target key end

     0   :  { %s1731_s17 = smov 0   ;;  %s2326_s0 = inlined_call_operand.vmem [shape: f32[2,16,256], index: 0, kind: input, shape index: {}]   ;;  %s2327_s1 = inlined_call_operand.vmem [shape: s32[1,256], index: 1, kind: input, shape index: {}]   ;;  %s2328_s2 = inlined_call_operand.vmem [shape: s32[1,256], index: 2, kind: input, shape index: {}]   ;;  %s2329_s3 = inlined_call_operand.vmem [shape: bf16[16,144], index: 3, kind: input, shape index: {}]   ;;  %s2330_s4 = inlined_call_operand.vmem [shape: f32[16,1], index: 4, kind: input, shape index: {}]   ;;  %s2331_s5 = inlined_call_operand.vmem [shape: bf16[16,144], index: 5, kind: input, shape index: {}]   ;;  %s2332_s6 = inlined_call_operand.vmem [shape: f32[16,1], index: 6, kind: input, shape index: {}]   ;;  %s2333_s7 = inlined_call_operand.vmem [shape: bf16[4,16], index: 7, kind: input, shape index: {}]   ;;  %s2334_s8 = inlined_call_operand.vmem [shape: f32[4,1], index: 8, kind: input, shape index: {}]   ;;  %s2335_s9 = inlined_call_operand.vmem [shape: bf16[16,4], index: 9, kind: input, shape index: {}]   ;;  %s2336_s10 = inlined_call_operand.vmem [shape: f32[16,1], index: 10, kind: input, shape index: {}]   ;;  %s2337_s11 = inlined_call_operand.vmem [shape: f32[2,16,256], index: 11, kind: output, shape index: {}]  }
   0x1 LB: > { %s1384_s18 = sadd.s32 4294967295, %s1660_s17   ;;  %p1388_p0 = scmp.ge.s32.totalorder %s1660_s17, 1  ;;  %s1660_s17 = sphi %s1731_s17, %s21_s17  }
   0x2   : > { %p337_p1 = scmp.lt.s32.totalorder %s1660_s17, 3 }
   0x4   : > { %p338_p2 = pnand %p1388_p0, %p337_p1 }
   0x5   : > { %p377_p3 = scmp.lt.s32.totalorder (!%p338_p2), %s1384_s18, 1  ;;  %s1662_s23 = smov (!%p338_p2), 113  }
   0x6   : > { %341 = sbr.rel (%p338_p2) target bundleno = 993 (0x3e1), region = 64  ;;  %s1663_s24 = smov (!%p338_p2), 112  }
   0x7   : > { %s1664_s25 = smov (!%p338_p2), 127   ;;  %s1665_s26 = smov (!%p338_p2), 1  }
   0x8   : > { %s1666_s27 = smov (!%p338_p2), 15   ;;  %s1667_s28 = smov (!%p338_p2), 16  }
   0x9   : > { %s1668_s29 = smov (!%p338_p2), 17   ;;  %s1669_s30 = smov (!%p338_p2), 111  }
   0xb   : > { %s2428_s18 = smov (!%p377_p3, %s1384_s18), 1  ;;  %v414_v7 = vlaneseq  ;;  %v395_v8 = vld [vmem:[%s2328_s2] sm:$0x3] }
   0xc   : > { %s1431_s19 = sshll.u32 %s2428_s18, 5  ;;  %v396_v11 = vperm.slane %v395_v8, 0  ;;  %v397_v12 = vperm.slane %v395_v8, 1  ;;  %v392_v23 = vld [vmem:[%s2327_s1] sm:$0x3] }
   0xd   : > { %s1747_s22 = scalar_lea.vmem %s2326_s0, %s1431_s19  ;;  %v1775_v9 = vand.u32 127, %v414_v7  ;;  %v393_v30 = vperm.slane %v392_v23, 0  ;;  %v394_v31 = vperm.slane %v392_v23, 1 }
   0xe   : > { %v388_v0 = vld [vmem:[%s1747_s22] sm:$0xff]  ;;  %v1751_v1 = vld [vmem:[%s1747_s22 + $0x10] sm:$0xff]  ;;  %v389_v3 = vld [vmem:[%s1747_s22 + $0x8] sm:$0xff]  ;;  %vm1778_vm1 = vcmp.le.s32.totalorder %v396_v11, 14  ;;  %vm1782_vm2 = vcmp.le.s32.totalorder %v397_v12, 14  ;;  %vm1821_vm7 = vcmp.ge.s32.totalorder %v396_v11, 1 }
   0xf   : > { %v1465_v2 = vpack.i.bf16 %v1751_v1, %v388_v0  ;;  %v391_v4 = vld [vmem:[%s1747_s22 + $0x18] sm:$0xff]  ;;  %vm2344_vm0 = vcmp.lt.s32.totalorder %v1775_v9, 127  ;;  %v1809_v34 = vpack.c.bf16 %v389_v3, %v388_v0  ;;  %vm2339_vm3 = vcmp.lt.s32.totalorder %v1775_v9, 113 }
  0x10   : > { %v1470_v5 = vpack.i.bf16 %v391_v4, %v389_v3  ;;  %vm1812_vm4 = vcmp.le.s32.totalorder %v393_v30, 14  ;;  %vm1816_vm5 = vcmp.le.s32.totalorder %v394_v31, 14  ;;  %vm2342_vm6 = vcmp.lt.s32.totalorder %v1775_v9, 112 }
  0x11   : > { %1466 = vrot.lane.b32.xlu1 %v1465_v2, %s1662_s23  ;;  %1456 = vrot.lane.b32.xlu0 %v1465_v2, %s1663_s24  ;;  %vm1825_vm8 = vcmp.ge.s32.totalorder %v397_v12, 1  ;;  %v1830_v39 = vpack.c.bf16 %v391_v4, %v1751_v1  ;;  %vm2338_vm9 = vcmp.lt.s32.totalorder %v1775_v9, 1  ;;  %v612_v50 = vunpack.c.l.b16 %v1809_v34  ;;  %vm1845_vm10 = vmand %vm1812_vm4, %vm1821_vm7 }
  0x12   : > { %1476 = vrot.lane.b32.xlu2 %v1465_v2, %s1664_s25  ;;  %v613_v59 = vunpack.c.h.b16 %v1809_v34  ;;  %vm1863_vm11 = vmand %vm1816_vm5, %vm1825_vm8  ;;  %vm1883_vm12 = vcmp.ge.s32.totalorder %v393_v30, 1  ;;  %vm1891_vm13 = vcmp.ge.s32.totalorder %v394_v31, 1  ;;  %vm2340_vm14 = vcmp.lt.s32.totalorder %v1775_v9, 15 }
  0x13   : > { %v614_v58 = vunpack.c.l.b16 %v1830_v39  ;;  %vm2341_vm15 = vcmp.lt.s32.totalorder %v1775_v9, 16 }
  0x19   : > { %1471 = vrot.lane.b32.xlu1 %v1470_v5, %s1662_s23  ;;  %1461 = vrot.lane.b32.xlu0 %v1470_v5, %s1663_s24 }
  0x1a   : > { %1481 = vrot.lane.b32.xlu2 %v1470_v5, %s1664_s25 }
  0x21   : > { %1491 = vrot.lane.b32.xlu1 %v1470_v5, %s1665_s26  ;;  %1486 = vrot.lane.b32.xlu0 %v1465_v2, %s1665_s26 }
  0x22   : > { %1496 = vrot.lane.b32.xlu2 %v1465_v2, %s1666_s27 }
  0x29   : > { %1506 = vrot.lane.b32.xlu1 %v1465_v2, %s1667_s28  ;;  %1501 = vrot.lane.b32.xlu0 %v1470_v5, %s1666_s27 }
  0x2a   : > { %1511 = vrot.lane.b32.xlu2 %v1470_v5, %s1667_s28 }
  0x31   : > { %1521 = vrot.lane.b32.xlu1 %v1470_v5, %s1668_s29  ;;  %1516 = vrot.lane.b32.xlu0 %v1465_v2, %s1668_s29 }
  0x32   : > { %1526 = vrot.lane.b32.xlu2 %v1465_v2, %s1669_s30 }
  0x39   : > { %1531 = vrot.lane.b32.xlu0 %v1470_v5, %s1669_s30 }
  0x6c   : > { %v1477_v6 = vpop.permute.xlu2 %1476 }
  0x6d   : > { %v1479_v13 = vunpack.i.h.bf16 %v1477_v6  ;;  %v1478_v14 = vunpack.i.l.bf16 %v1477_v6 }
  0x74   : > { %v1482_v10 = vpop.permute.xlu2 %1481 }
  0x75   : > { %v1484_v15 = vunpack.i.h.bf16 %v1482_v10  ;;  %v1483_v16 = vunpack.i.l.bf16 %v1482_v10  ;;  %v2371_v10 = vmov 0 }
  0x76   : > { %v2372_v10 = vsel %vm1883_vm12, 4294967295, %v2371_v10 }
  0x77   : > { %v499_v19 = vsel %vm2344_vm0, %v1478_v14, %v1483_v16  ;;  %v500_v20 = vsel %vm2344_vm0, %v1479_v13, %v1484_v15  ;;  %v501_v21 = vsel %vm2344_vm0, %v1483_v16, %v1478_v14  ;;  %v502_v22 = vsel %vm2344_vm0, %v1484_v15, %v1479_v13  ;;  %vm2029_vm0 = vmand %vm1812_vm4, %vm1778_vm1 }
  0x78   : > { %v503_v26 = vsel %vm1778_vm1, %v499_v19, 0.0  ;;  %v504_v27 = vsel %vm1782_vm2, %v501_v21, 0.0  ;;  %v505_v28 = vsel %vm1778_vm1, %v500_v20, 0.0  ;;  %v506_v29 = vsel %vm1782_vm2, %v502_v22, 0.0 }
  0x79   : > { %v1805_v32 = vpack.c.bf16 %v504_v27, %v503_v26  ;;  %v1807_v33 = vpack.c.bf16 %v506_v29, %v505_v28  ;;  %v2373_v15 = vmov 0  ;;  %v615_v21 = vunpack.c.h.b16 %v1830_v39 }
  0x7a   : > { %v2374_v15 = vsel %vm1891_vm13, 4294967295, %v2373_v15 }
  0x7b   : > { %v622_v41 = vunpack.c.l.b16 %v1805_v32  ;;  %v624_v42 = vunpack.c.l.b16 %v1807_v33  ;;  %v623_v43 = vunpack.c.h.b16 %v1805_v32  ;;  %v625_v44 = vunpack.c.h.b16 %v1807_v33 }
  0x7c   : > { %v1832_v40 = vpop.permute.xlu2 %1496  ;;  %v616_v32 = vpack.c.b16 %v614_v58, %v612_v50  ;;  %v617_v33 = vpack.c.b16 %v615_v21, %v613_v59 }
  0x7d   : > { %v1499_v49 = vunpack.i.h.bf16 %v1832_v40 }
  0x83   : > { %v1467_v24 = vpop.permute.xlu1 %1466  ;;  %v1457_v25 = vpop.permute.xlu0 %1456 }
  0x84   : > { %v1469_v45 = vunpack.i.h.bf16 %v1467_v24  ;;  %v1468_v46 = vunpack.i.l.bf16 %v1467_v24  ;;  %v1459_v55 = vunpack.i.h.bf16 %v1457_v25  ;;  %v1458_v56 = vunpack.i.l.bf16 %v1457_v25 }
  0x8b   : > { %v1472_v47 = vpop.permute.xlu1 %1471  ;;  %v1462_v48 = vpop.permute.xlu0 %1461 }
  0x8c   : > { %v1474_v51 = vunpack.i.h.bf16 %v1472_v47  ;;  %v1473_v52 = vunpack.i.l.bf16 %v1472_v47  ;;  %v1464_v53 = vunpack.i.h.bf16 %v1462_v48  ;;  %v1463_v54 = vunpack.i.l.bf16 %v1462_v48 }
  0x8e   : > { %v518_v60 = vsel %vm2339_vm3, %v1468_v46, %v1473_v52  ;;  %v519_v61 = vsel %vm2339_vm3, %v1469_v45, %v1474_v51  ;;  %v520_v62 = vsel %vm2339_vm3, %v1473_v52, %v1468_v46  ;;  %v521_v63 = vsel %vm2339_vm3, %v1474_v51, %v1469_v45  ;;  %vm1951_vm3 = vmand %vm1891_vm13, %vm1782_vm2 }
  0x8f   : > { %v539_v1 = vsel %vm2342_vm6, %v1458_v56, %v1463_v54  ;;  %v540_v2 = vsel %vm2342_vm6, %v1459_v55, %v1464_v53  ;;  %v541_v3 = vsel %vm2342_vm6, %v1463_v54, %v1458_v56  ;;  %v542_v4 = vsel %vm2342_vm6, %v1464_v53, %v1459_v55  ;;  %vm2004_vm6 = vmand %vm1891_vm13, %vm1825_vm8 }
  0x90   : > { %v543_v5 = vsel %vm1812_vm4, %v539_v1, 0.0  ;;  %v544_v6 = vsel %vm1816_vm5, %v541_v3, 0.0  ;;  %v545_v7 = vsel %vm1812_vm4, %v540_v2, 0.0  ;;  %v546_v8 = vsel %vm1816_vm5, %v542_v4, 0.0 }
  0x91   : > { %v547_v11 = vpack.c.bf16 %v544_v6, %v543_v5  ;;  %v548_v12 = vpack.c.bf16 %v546_v8, %v545_v7  ;;  %v524_v13 = vsel %vm1845_vm10, %v518_v60, 0.0  ;;  %v525_v14 = vsel %vm1863_vm11, %v520_v62, 0.0 }
  0x92   : > { %v526_v16 = vsel %vm1845_vm10, %v519_v61, 0.0  ;;  %v527_v19 = vsel %vm1863_vm11, %v521_v63, 0.0  ;;  %v528_v20 = vpack.c.bf16 %v525_v14, %v524_v13  ;;  %v1498_v62 = vunpack.i.l.bf16 %v1832_v40  ;;  %v1512_v63 = vpop.permute.xlu2 %1511  ;;  %v663_v13 = vld [vmem:[%s2330_s4 + $0x8] sm:$0xff] }
  0x93   : > { %v1492_v22 = vpop.permute.xlu1 %1491  ;;  %v1487_v23 = vpop.permute.xlu0 %1486  ;;  %v642_v24 = vunpack.c.l.b16 %v547_v11  ;;  %v644_v25 = vunpack.c.l.b16 %v548_v12  ;;  %v643_v26 = vunpack.c.h.b16 %v547_v11  ;;  %v645_v27 = vunpack.c.h.b16 %v548_v12  ;;  %v662_v12 = vld [vmem:[%s2330_s4] sm:$0xff] }
  0x94   : > { %v1494_v28 = vunpack.i.h.bf16 %v1492_v22  ;;  %v1493_v29 = vunpack.i.l.bf16 %v1492_v22  ;;  %v1489_v30 = vunpack.i.h.bf16 %v1487_v23  ;;  %v1488_v31 = vunpack.i.l.bf16 %v1487_v23 }
  0x95   : > { %v646_v45 = vpack.c.b16 %v644_v25, %v642_v24  ;;  %v647_v46 = vpack.c.b16 %v645_v27, %v643_v26  ;;  %v529_v47 = vpack.c.bf16 %v527_v19, %v526_v16  ;;  %v632_v48 = vunpack.c.l.b16 %v528_v20 }
  0x96   : > { %v479_v51 = vsel %vm2338_vm9, %v1489_v30, %v1494_v28  ;;  %v481_v52 = vsel %vm2338_vm9, %v1494_v28, %v1489_v30  ;;  %v478_v53 = vsel %vm2338_vm9, %v1488_v31, %v1493_v29  ;;  %v480_v54 = vsel %vm2338_vm9, %v1493_v29, %v1488_v31  ;;  %vm1943_vm9 = vmand %vm1883_vm12, %vm1778_vm1 }
  0x97   : > { %687 = vmatpush.bf16.msra.mxu0 %v646_v45  ;;  %715 = vmatpush.bf16.msra.mxu2 %v647_v46  ;;  %v634_v55 = vunpack.c.l.b16 %v529_v47  ;;  %v633_v56 = vunpack.c.h.b16 %v528_v20  ;;  %v635_v60 = vunpack.c.h.b16 %v529_v47  ;;  %v482_v61 = vsel %vm1821_vm7, %v480_v54, 0.0 }
  0x98   : > { %v483_v1 = vsel %vm1825_vm8, %v478_v53, 0.0  ;;  %v484_v2 = vsel %vm1821_vm7, %v481_v52, 0.0  ;;  %v485_v3 = vsel %vm1825_vm8, %v479_v51, 0.0  ;;  %v626_v8 = vpack.c.b16 %v624_v42, %v622_v41 }
  0x99   : > { %v636_v4 = vpack.c.b16 %v634_v55, %v632_v48  ;;  %v637_v5 = vpack.c.b16 %v635_v60, %v633_v56  ;;  %v486_v6 = vpack.c.bf16 %v483_v1, %v482_v61  ;;  %v487_v7 = vpack.c.bf16 %v485_v3, %v484_v2 }
  0x9a   : > { %v627_v11 = vpack.c.b16 %v625_v44, %v623_v43  ;;  %v1514_v41 = vunpack.i.h.bf16 %v1512_v63  ;;  %v1513_v42 = vunpack.i.l.bf16 %v1512_v63  ;;  %v1670_v23 = vmov 0  }
  0x9b   : > { %688 = vmatpush.bf16.msra.mxu0 %v636_v4  ;;  %716 = vmatpush.bf16.msra.mxu2 %v637_v5  ;;  %v1507_v14 = vpop.permute.xlu1 %1506  ;;  %v1502_v16 = vpop.permute.xlu0 %1501  ;;  %v602_v39 = vunpack.c.l.b16 %v486_v6  ;;  %v604_v50 = vunpack.c.l.b16 %v487_v7  ;;  %v603_v58 = vunpack.c.h.b16 %v486_v6  ;;  %v605_v34 = vunpack.c.h.b16 %v487_v7 }
  0x9c   : > { %v1509_v43 = vunpack.i.h.bf16 %v1507_v14  ;;  %v1508_v44 = vunpack.i.l.bf16 %v1507_v14  ;;  %v1504_v19 = vunpack.i.h.bf16 %v1502_v16  ;;  %v1503_v20 = vunpack.i.l.bf16 %v1502_v16  ;;  %1535 = vset.pattern.permute.xlu1 %v1670_v23  ;;  %1536 = vset.pattern.permute.xlu2 %v1670_v23 }
  0x9d   : > { %666 = vperm.xlu1 %1535, %v662_v12   ;;  %671 = vperm.xlu2 %1536, %v663_v13   ;;  %v606_v56 = vpack.c.b16 %v604_v50, %v602_v39  ;;  %v607_v60 = vpack.c.b16 %v605_v34, %v603_v58  ;;  %v2379_v4 = vmov 0 }
  0x9e   : > { %v458_v21 = vsel %vm2340_vm14, %v1499_v49, %v1504_v19  ;;  %v460_v24 = vsel %vm2340_vm14, %v1504_v19, %v1499_v49  ;;  %v457_v25 = vsel %vm2340_vm14, %v1498_v62, %v1503_v20  ;;  %v459_v26 = vsel %vm2340_vm14, %v1503_v20, %v1498_v62  ;;  %1617 = vset.pattern.permute.xlu0 %v1670_v23 }
  0x9f   : > { %689 = vmatpush.bf16.msra.mxu0 %v626_v8  ;;  %717 = vmatpush.bf16.msra.mxu2 %v627_v11  ;;  %v438_v27 = vsel %vm2341_vm15, %v1508_v44, %v1513_v42  ;;  %v439_v28 = vsel %vm2341_vm15, %v1509_v43, %v1514_v41  ;;  %v440_v40 = vsel %vm2341_vm15, %v1513_v42, %v1508_v44  ;;  %v463_v49 = vsel %vm1943_vm9, %v459_v26, 0.0 }
  0xa0   : > { %v441_v29 = vsel %vm2341_vm15, %v1514_v41, %v1509_v43  ;;  %v464_v30 = vsel %vm1951_vm3, %v457_v25, 0.0  ;;  %v465_v31 = vsel %vm1943_vm9, %v460_v24, 0.0  ;;  %v466_v45 = vsel %vm1951_vm3, %v458_v21, 0.0  ;;  %vm1996_vm15 = vmand %vm1883_vm12, %vm1821_vm7  ;;  %v1527_v41 = vpop.permute.xlu2 %1526 }
  0xa1   : > { %v467_v46 = vpack.c.bf16 %v464_v30, %v463_v49  ;;  %v468_v47 = vpack.c.bf16 %v466_v45, %v465_v31  ;;  %v442_v48 = vsel %vm1883_vm12, %v440_v40, 0.0  ;;  %v443_v51 = vsel %vm1891_vm13, %v438_v27, 0.0 }
  0xa2   : > { %vm2343_vm14 = vcmp.lt.s32.totalorder %v1775_v9, 17  ;;  %v444_v52 = vsel %vm1883_vm12, %v441_v29, 0.0  ;;  %v445_v53 = vsel %vm1891_vm13, %v439_v28, 0.0  ;;  %v446_v62 = vpack.c.bf16 %v443_v51, %v442_v48  ;;  %v1434_v48 = vld [vmem:[%s2329_s3 + $0x4] sm:$0xf0] }
  0xa3   : > { %690 = vmatpush.bf16.msra.mxu0 %v616_v32  ;;  %718 = vmatpush.bf16.msra.mxu2 %v617_v33  ;;  %v1522_v54 = vpop.permute.xlu1 %1521  ;;  %v1517_v55 = vpop.permute.xlu0 %1516  ;;  %v592_v61 = vunpack.c.l.b16 %v467_v46  ;;  %v2380_v4 = vsel %vm1996_vm15, 4294967295, %v2379_v4  ;;  %v594_v5 = vunpack.c.l.b16 %v468_v47  ;;  %v593_v6 = vunpack.c.h.b16 %v467_v46 }
  0xa4   : > { %v1524_v63 = vunpack.i.h.bf16 %v1522_v54  ;;  %v1523_v1 = vunpack.i.l.bf16 %v1522_v54  ;;  %v1519_v2 = vunpack.i.h.bf16 %v1517_v55  ;;  %v1518_v3 = vunpack.i.l.bf16 %v1517_v55 }
  0xa5   : > { %v595_v7 = vunpack.c.h.b16 %v468_v47  ;;  %v447_v8 = vpack.c.bf16 %v445_v53, %v444_v52  ;;  %v2381_v11 = vmov 0  ;;  %v582_v42 = vunpack.c.l.b16 %v446_v62  ;;  %v1395_v47 = vld [vmem:[%s2329_s3] sm:$0xf] }
  0xa6   : > { %v2382_v11 = vsel %vm2004_vm6, 4294967295, %v2381_v11  ;;  %v418_v12 = vsel %vm2343_vm14, %v1519_v2, %v1524_v63  ;;  %v420_v13 = vsel %vm2343_vm14, %v1524_v63, %v1519_v2  ;;  %v417_v14 = vsel %vm2343_vm14, %v1518_v3, %v1523_v1 }
  0xa7   : > { %v419_v16 = vsel %vm2343_vm14, %v1523_v1, %v1518_v3  ;;  %691 = vmatpush.bf16.msra.mxu0 %v606_v56  ;;  %719 = vmatpush.bf16.msra.mxu2 %v607_v60  ;;  %v584_v32 = vunpack.c.l.b16 %v447_v8  ;;  %v583_v33 = vunpack.c.h.b16 %v446_v62  ;;  %v585_v44 = vunpack.c.h.b16 %v447_v8 }
  0xa8   : > { %v423_v43 = vsel %vm1996_vm15, %v419_v16, 0.0  ;;  %v424_v19 = vsel %vm2004_vm6, %v417_v14, 0.0  ;;  %v425_v20 = vsel %vm1996_vm15, %v420_v13, 0.0  ;;  %v426_v23 = vsel %vm2004_vm6, %v418_v12, 0.0  ;;  %vm2037_vm6 = vmand %vm1816_vm5, %vm1782_vm2  ;;  %v1433_v12 = vld [vmem:[%s2329_s3 + $0x4] sm:$0xf] }
  0xa9   : > { %v596_v39 = vpack.c.b16 %v594_v5, %v592_v61  ;;  %v597_v50 = vpack.c.b16 %v595_v7, %v593_v6  ;;  %v427_v58 = vpack.c.bf16 %v424_v19, %v423_v43  ;;  %v428_v34 = vpack.c.bf16 %v426_v23, %v425_v20  ;;  %v1397_v13 = vld [vmem:[%s2329_s3 + $0x8] sm:$0xf0] }
  0xaa   : > { %v1529_v21 = vunpack.i.h.bf16 %v1527_v41  ;;  %v1528_v24 = vunpack.i.l.bf16 %v1527_v41  ;;  %vm2347_vm14 = vcmp.lt.s32.totalorder %v1775_v9, 111  ;;  %v586_v40 = vpack.c.b16 %v584_v32, %v582_v42 }
  0xab   : > { %692 = vmatpush.bf16.msra.mxu0 %v596_v39  ;;  %720 = vmatpush.bf16.msra.mxu2 %v597_v50  ;;  %v1532_v25 = vpop.permute.xlu0 %1531  ;;  %v587_v49 = vpack.c.b16 %v585_v44, %v583_v33  ;;  %v572_v30 = vunpack.c.l.b16 %v427_v58  ;;  %v574_v31 = vunpack.c.l.b16 %v428_v34  ;;  %v573_v45 = vunpack.c.h.b16 %v427_v58 }
  0xac   : > { %v1534_v27 = vunpack.i.h.bf16 %v1532_v25  ;;  %v1533_v28 = vunpack.i.l.bf16 %v1532_v25  ;;  %v575_v46 = vunpack.c.h.b16 %v428_v34  ;;  %v1396_v3 = vor.u32 %v1434_v48, %v1395_v47 }
  0xad   : > { %v576_v1 = vpack.c.b16 %v574_v31, %v572_v30  ;;  %v1400_v41 = vor.u32 %v1433_v12, %v1397_v13 }
  0xae   : > { %v558_v51 = vsel %vm2347_vm14, %v1528_v24, %v1533_v28  ;;  %v559_v52 = vsel %vm2347_vm14, %v1529_v21, %v1534_v27  ;;  %v560_v53 = vsel %vm2347_vm14, %v1533_v28, %v1528_v24  ;;  %v561_v54 = vsel %vm2347_vm14, %v1534_v27, %v1529_v21 }
  0xaf   : > { %693 = vmatpush.bf16.msra.mxu0 %v586_v40  ;;  %721 = vmatpush.bf16.msra.mxu2 %v587_v49  ;;  %v564_v55 = vsel %vm2029_vm0, %v558_v51, 0.0  ;;  %v565_v56 = vsel %vm2037_vm6, %v560_v53, 0.0  ;;  %v566_v60 = vsel %vm2029_vm0, %v559_v52, 0.0  ;;  %v567_v61 = vsel %vm2037_vm6, %v561_v54, 0.0 }
  0xb0   : > { %v568_v62 = vpack.c.bf16 %v565_v56, %v564_v55  ;;  %v569_v63 = vpack.c.bf16 %v567_v61, %v566_v60  ;;  %v577_v2 = vpack.c.b16 %v575_v46, %v573_v45  ;;  %vm2348_vm14 = vcmask 130048   ;;  %v985_v61 = vld [vmem:[%s2332_s6] sm:$0xff] }
  0xb2   : > { %v652_v5 = vunpack.c.l.b16 %v568_v62  ;;  %v654_v6 = vunpack.c.l.b16 %v569_v63  ;;  %v653_v7 = vunpack.c.h.b16 %v568_v62  ;;  %v655_v8 = vunpack.c.h.b16 %v569_v63  ;;  %v986_v62 = vld [vmem:[%s2332_s6 + $0x8] sm:$0xff]  ;;  %v1109_v63 = vld [vmem:[%s2336_s10] sm:$0xff] }
  0xb3   : > { %694 = vmatpush.bf16.msra.mxu0 %v576_v1  ;;  %722 = vmatpush.bf16.msra.mxu2 %v577_v2  ;;  %v1110_v1 = vld [vmem:[%s2336_s10 + $0x8] sm:$0xff] }
  0xb4   : > { %v656_v14 = vpack.c.b16 %v654_v6, %v652_v5  ;;  %v657_v16 = vpack.c.b16 %v655_v8, %v653_v7 }
  0xb6   : > { %695 = vmatmul.bf16.vlgmr.msra.gmra.mxu0 %v1396_v3  ;;  %723 = vmatmul.bf16.vlgmr.msra.gmra.mxu2 %v1396_v3 }
  0xb7   : > { %708 = vmatpush.bf16.msra.mxu1 %v656_v14  ;;  %736 = vmatpush.bf16.msra.mxu3 %v657_v16 }
  0xba   : > { %1401 = vmatmul.msk.bf16.vlgmr.msra.gmra.mxu1 %vm2348_vm14, %v1400_v41  ;;  %1402 = vmatmul.msk.bf16.vlgmr.msra.gmra.mxu3 %vm2348_vm14, %v1400_v41  ;;  %vm2387_vm14 = vcmp.lt.s32.totalorder %v1775_v9, 127 }
  0xbb   : > { %vm2388_vm15 = vmmov %vm2387_vm14 }
  0xbc   : > { %vm2389_vm13 = vmmov %vm2387_vm14 }
  0xbd   : > { %vm2390_vm12 = vmmov %vm2389_vm13 }
  0xf7   : > { %v672_v20 = vpop.permute.xlu2 %671 }
 0x10f   : > { %v667_v32 = vpop.permute.xlu1 %666 }
 0x133   : > { %v696_v42 = vpop.f32.mrf.mxu0 }
 0x134   : > { %v697_v43 = vadd.f32 %v696_v42, %v667_v32 }
 0x137   : > { %v710_v33 = vpop.f32.mrf.mxu1 }
 0x138   : > { %v711_v39 = vadd.f32 %v710_v33, %v697_v43 }
 0x139   : > { %v724_v44 = vpop.f32.mrf.mxu2 }
 0x13a   : > { %v725_v19 = vadd.f32 %v724_v44, %v667_v32  ;;  %v743_v24 = vmax.f32 %v711_v39, 0.0 }
 0x13b   : > { %v698_v23 = vpop.f32.mrf.mxu0 }
 0x13c   : > { %v699_v58 = vadd.f32 %v698_v23, %v672_v20 }
 0x13d   : > { %v738_v50 = vpop.f32.mrf.mxu3 }
 0x13e   : > { %v739_v34 = vadd.f32 %v738_v50, %v725_v19 }
 0x13f   : > { %v712_v21 = vpop.f32.mrf.mxu1 }
 0x140   : > { %v744_v25 = vmax.f32 %v739_v34, 0.0  ;;  %v713_v27 = vadd.f32 %v712_v21, %v699_v58 }
 0x141   : > { %v726_v28 = vpop.f32.mrf.mxu2 }
 0x142   : > { %v745_v40 = vmax.f32 %v713_v27, 0.0  ;;  %v819_v49 = vpack.c.bf16 %v744_v25, %v743_v24  ;;  %v727_v30 = vadd.f32 %v726_v28, %v672_v20 }
 0x144   : > { %v1547_v31 = vpack.i.bf16 %v745_v40, %v743_v24  ;;  %v935_v52 = vunpack.c.l.b16 %v819_v49  ;;  %v936_v54 = vunpack.c.h.b16 %v819_v49 }
 0x145   : > { %v740_v45 = vpop.f32.mrf.mxu3 }
 0x146   : > { %v741_v46 = vadd.f32 %v740_v45, %v727_v30  ;;  %1548 = vrot.lane.b32.xlu1 %v1547_v31, %s1664_s25  ;;  %1543 = vrot.lane.b32.xlu2 %v1547_v31, %s1662_s23 }
 0x147   : > { %1538 = vrot.lane.b32.xlu0 %v1547_v31, %s1663_s24 }
 0x148   : > { %v746_v47 = vmax.f32 %v741_v46, 0.0  ;;  %v1407_v46 = vld [vmem:[%s2331_s5 + $0x8] sm:$0xf0] }
 0x14a   : > { %v1557_v48 = vpack.i.bf16 %v746_v47, %v744_v25  ;;  %v820_v51 = vpack.c.bf16 %v746_v47, %v745_v40  ;;  %v1435_v40 = vld [vmem:[%s2331_s5 + $0x4] sm:$0xf] }
 0x14c   : > { %v937_v53 = vunpack.c.l.b16 %v820_v51  ;;  %v938_v55 = vunpack.c.h.b16 %v820_v51 }
 0x14e   : > { %1558 = vrot.lane.b32.xlu1 %v1557_v48, %s1663_s24  ;;  %1568 = vrot.lane.b32.xlu2 %v1557_v48, %s1664_s25  ;;  %v2077_v56 = vpack.c.b16 %v937_v53, %v935_v52  ;;  %v2079_v60 = vpack.c.b16 %v938_v55, %v936_v54 }
 0x14f   : > { %1553 = vrot.lane.b32.xlu0 %v1547_v31, %s1669_s30 }
 0x156   : > { %1578 = vrot.lane.b32.xlu1 %v1557_v48, %s1669_s30  ;;  %1573 = vrot.lane.b32.xlu2 %v1547_v31, %s1665_s26 }
 0x157   : > { %1563 = vrot.lane.b32.xlu0 %v1557_v48, %s1662_s23 }
 0x15e   : > { %1583 = vrot.lane.b32.xlu1 %v1547_v31, %s1666_s27  ;;  %1598 = vrot.lane.b32.xlu2 %v1557_v48, %s1666_s27 }
 0x15f   : > { %1588 = vrot.lane.b32.xlu0 %v1557_v48, %s1665_s26 }
 0x166   : > { %1603 = vrot.lane.b32.xlu1 %v1557_v48, %s1667_s28  ;;  %1608 = vrot.lane.b32.xlu2 %v1547_v31, %s1668_s29 }
 0x167   : > { %1593 = vrot.lane.b32.xlu0 %v1547_v31, %s1667_s28 }
 0x16e   : > { %989 = vperm.xlu1 %1535, %v985_v61   ;;  %994 = vperm.xlu2 %1536, %v986_v62   ;;  %v2157_v62 = vor.u32 %v1435_v40, %v1407_v46 }
 0x16f   : > { %1613 = vrot.lane.b32.xlu0 %v1557_v48, %s1668_s29  ;;  %s2313_s29 = scalar_lea.vmem %s2337_s11, %s1431_s19 }
 0x176   : > { %1113 = vperm.xlu1 %1535, %v1109_v63   ;;  %1118 = vperm.xlu2 %1536, %v1110_v1  }
 0x1a0   : > { %v2103_v2 = vpop.permute.xlu2 %1543 }
 0x1a1   : > { %v1546_v47 = vunpack.i.h.bf16 %v2103_v2  ;;  %v1545_v52 = vunpack.i.l.bf16 %v2103_v2 }
 0x1a8   : > { %v1569_v3 = vpop.permute.xlu2 %1568 }
 0x1a9   : > { %v1571_v13 = vunpack.i.h.bf16 %v1569_v3  ;;  %v1570_v14 = vunpack.i.l.bf16 %v1569_v3 }
 0x1b0   : > { %v2105_v6 = vpop.permute.xlu2 %1573 }
 0x1b1   : > { %v1576_v53 = vunpack.i.h.bf16 %v2105_v6  ;;  %v1575_v54 = vunpack.i.l.bf16 %v2105_v6 }
 0x1b8   : > { %v1549_v5 = vpop.permute.xlu1 %1548  ;;  %v2127_v25 = vpop.permute.xlu2 %1598 }
 0x1b9   : > { %v1551_v7 = vunpack.i.h.bf16 %v1549_v5  ;;  %v1550_v8 = vunpack.i.l.bf16 %v1549_v5  ;;  %v1539_v12 = vpop.permute.xlu0 %1538  ;;  %v1601_v35 = vunpack.i.h.bf16 %v2127_v25  ;;  %v1600_v55 = vunpack.i.l.bf16 %v2127_v25 }
 0x1ba   : > { %v1541_v23 = vunpack.i.h.bf16 %v1539_v12  ;;  %v1540_v39 = vunpack.i.l.bf16 %v1539_v12 }
 0x1bb   : > { %v829_v16 = vsel %vm2387_vm14, %v1550_v8, %v1570_v14  ;;  %v830_v41 = vsel %vm2388_vm15, %v1551_v7, %v1571_v13  ;;  %v831_v42 = vsel %vm2389_vm13, %v1570_v14, %v1550_v8  ;;  %v832_v32 = vsel %vm2390_vm12, %v1571_v13, %v1551_v7 }
 0x1bc   : > { %v833_v33 = vsel %vm1778_vm1, %v829_v16, 0.0  ;;  %v834_v43 = vsel %vm1782_vm2, %v831_v42, 0.0  ;;  %v835_v44 = vsel %vm1778_vm1, %v830_v41, 0.0  ;;  %v836_v19 = vsel %vm1782_vm2, %v832_v32, 0.0 }
 0x1bd   : > { %v2123_v21 = vpack.c.bf16 %v834_v43, %v833_v33  ;;  %v2125_v24 = vpack.c.bf16 %v836_v19, %v835_v44  ;;  %vm2391_vm12 = vcmp.lt.s32.totalorder %v1775_v9, 112 }
 0x1be   : > { %vm2392_vm1 = vmmov %vm2391_vm12 }
 0x1bf   : > { %vm2393_vm2 = vmmov %vm2392_vm1  ;;  %v945_v3 = vunpack.c.l.b16 %v2123_v21  ;;  %v947_v5 = vunpack.c.l.b16 %v2125_v24  ;;  %v946_v2 = vunpack.c.h.b16 %v2123_v21 }
 0x1c0   : > { %v1559_v20 = vpop.permute.xlu1 %1558  ;;  %vm2394_vm13 = vmmov %vm2392_vm1  ;;  %v1609_v21 = vpop.permute.xlu2 %1608 }
 0x1c1   : > { %v1561_v50 = vunpack.i.h.bf16 %v1559_v20  ;;  %v1560_v58 = vunpack.i.l.bf16 %v1559_v20  ;;  %v1554_v34 = vpop.permute.xlu0 %1553  ;;  %v949_v57 = vpack.c.b16 %v947_v5, %v945_v3 }
 0x1c2   : > { %v1556_v63 = vunpack.i.h.bf16 %v1554_v34  ;;  %v1555_v7 = vunpack.i.l.bf16 %v1554_v34 }
 0x1c3   : > { %v865_v27 = vsel %vm2391_vm12, %v1540_v39, %v1560_v58  ;;  %v866_v17 = vsel %vm2392_vm1, %v1541_v23, %v1561_v50  ;;  %v867_v18 = vsel %vm2393_vm2, %v1560_v58, %v1540_v39  ;;  %v868_v28 = vsel %vm2394_vm13, %v1561_v50, %v1541_v23 }
 0x1c4   : > { %v869_v49 = vsel %vm1812_vm4, %v865_v27, 0.0  ;;  %v870_v30 = vsel %vm1816_vm5, %v867_v18, 0.0  ;;  %v871_v31 = vsel %vm1812_vm4, %v866_v17, 0.0  ;;  %v872_v45 = vsel %vm1816_vm5, %v868_v28, 0.0 }
 0x1c5   : > { %v873_v48 = vpack.c.bf16 %v870_v30, %v869_v49  ;;  %v874_v51 = vpack.c.bf16 %v872_v45, %v871_v31  ;;  %vm2395_vm4 = vcmp.lt.s32.totalorder %v1775_v9, 111  ;;  %vm2399_vm12 = vcmp.lt.s32.totalorder %v1775_v9, 113 }
 0x1c6   : > { %vm2396_vm5 = vmmov %vm2395_vm4 }
 0x1c7   : > { %v965_v36 = vunpack.c.l.b16 %v873_v48  ;;  %v967_v61 = vunpack.c.l.b16 %v874_v51  ;;  %v966_v42 = vunpack.c.h.b16 %v873_v48  ;;  %v968_v32 = vunpack.c.h.b16 %v874_v51  ;;  %vm2397_vm14 = vmmov %vm2395_vm4 }
 0x1c8   : > { %v1579_v1 = vpop.permute.xlu1 %1578  ;;  %vm2398_vm15 = vmmov %vm2395_vm4 }
 0x1c9   : > { %v1581_v8 = vunpack.i.h.bf16 %v1579_v1  ;;  %v1580_v12 = vunpack.i.l.bf16 %v1579_v1  ;;  %v1564_v13 = vpop.permute.xlu0 %1563  ;;  %v969_v14 = vpack.c.b16 %v967_v61, %v965_v36  ;;  %vm2400_vm1 = vmmov %vm2399_vm12  ;;  %v970_v51 = vpack.c.b16 %v968_v32, %v966_v42 }
 0x1ca   : > { %v1566_v16 = vunpack.i.h.bf16 %v1564_v13  ;;  %v1565_v41 = vunpack.i.l.bf16 %v1564_v13  ;;  %vm2401_vm2 = vmmov %vm2400_vm1 }
 0x1cb   : > { %v883_v33 = vsel %vm2395_vm4, %v1555_v7, %v1580_v12  ;;  %v884_v43 = vsel %vm2396_vm5, %v1556_v63, %v1581_v8  ;;  %v885_v44 = vsel %vm2397_vm14, %v1580_v12, %v1555_v7  ;;  %v886_v19 = vsel %vm2398_vm15, %v1581_v8, %v1556_v63  ;;  %1009 = vmatpush.bf16.msrb.mxu1 %v969_v14  ;;  %vm2402_vm13 = vmmov %vm2400_vm1 }
 0x1cc   : > { %v848_v20 = vsel %vm2399_vm12, %v1546_v47, %v1566_v16  ;;  %v850_v23 = vsel %vm2400_vm1, %v1566_v16, %v1546_v47  ;;  %v847_v39 = vsel %vm2401_vm2, %v1545_v52, %v1565_v41  ;;  %v849_v50 = vsel %vm2402_vm13, %v1565_v41, %v1545_v52 }
 0x1cd   : > { %v851_v58 = vsel %vm1845_vm10, %v847_v39, 0.0  ;;  %v852_v34 = vsel %vm1863_vm11, %v849_v50, 0.0  ;;  %v853_v27 = vsel %vm1845_vm10, %v848_v20, 0.0  ;;  %v854_v17 = vsel %vm1863_vm11, %v850_v23, 0.0 }
 0x1ce   : > { %v855_v18 = vpack.c.bf16 %v852_v34, %v851_v58  ;;  %v856_v28 = vpack.c.bf16 %v854_v17, %v853_v27  ;;  %v887_v40 = vsel %vm2029_vm0, %v883_v33, 0.0  ;;  %v888_v49 = vsel %vm2037_vm6, %v885_v44, 0.0 }
 0x1cf   : > { %v889_v30 = vsel %vm2029_vm0, %v884_v43, 0.0  ;;  %v890_v31 = vsel %vm2037_vm6, %v886_v19, 0.0  ;;  %v891_v45 = vpack.c.bf16 %v888_v49, %v887_v40  ;;  %vm2403_vm0 = vcmp.lt.s32.totalorder %v1775_v9, 15 }
 0x1d0   : > { %v1584_v46 = vpop.permute.xlu1 %1583  ;;  %v955_v47 = vunpack.c.l.b16 %v855_v18  ;;  %v957_v0 = vunpack.c.l.b16 %v856_v28  ;;  %v892_v48 = vpack.c.bf16 %v890_v31, %v889_v30  ;;  %v956_v1 = vunpack.c.h.b16 %v855_v18  ;;  %vm2404_vm6 = vmmov %vm2403_vm0 }
 0x1d1   : > { %v1586_v52 = vunpack.i.h.bf16 %v1584_v46  ;;  %v1585_v36 = vunpack.i.l.bf16 %v1584_v46  ;;  %v1589_v61 = vpop.permute.xlu0 %1588  ;;  %v975_v63 = vunpack.c.l.b16 %v891_v45  ;;  %vm2405_vm10 = vmmov %vm2403_vm0  ;;  %v976_v13 = vunpack.c.h.b16 %v891_v45 }
 0x1d2   : > { %v1591_v7 = vunpack.i.h.bf16 %v1589_v61  ;;  %v1590_v8 = vunpack.i.l.bf16 %v1589_v61  ;;  %v959_v12 = vpack.c.b16 %v957_v0, %v955_v47  ;;  %v977_v26 = vunpack.c.l.b16 %v892_v48  ;;  %vm2410_vm15 = vmmov %vm2403_vm0 }
 0x1d3   : > { %v791_v29 = vsel %vm2403_vm0, %v1585_v36, %v1600_v55  ;;  %v792_v3 = vsel %vm2404_vm6, %v1586_v52, %v1601_v35  ;;  %v793_v5 = vsel %vm2405_vm10, %v1600_v55, %v1585_v36  ;;  %vm2406_vm11 = vcmp.lt.s32.totalorder %v1775_v9, 1 }
 0x1d4   : > { %v810_v14 = vsel %vm2406_vm11, %v1576_v53, %v1591_v7  ;;  %vm2407_vm4 = vmmov %vm2406_vm11  ;;  %1010 = vmatpush.bf16.msrb.mxu1 %v959_v12  ;;  %v794_v55 = vsel %vm2410_vm15, %v1601_v35, %v1586_v52  ;;  %v979_v32 = vpack.c.b16 %v977_v26, %v975_v63  ;;  %v978_v33 = vunpack.c.h.b16 %v892_v48 }
 0x1d5   : > { %v812_v16 = vsel %vm2407_vm4, %v1591_v7, %v1576_v53  ;;  %vm2408_vm5 = vmmov %vm2407_vm4  ;;  %v958_v43 = vunpack.c.h.b16 %v856_v28  ;;  %v948_v19 = vunpack.c.h.b16 %v2125_v24  ;;  %v795_v39 = vsel %vm1943_vm9, %v793_v5, 0.0 }
 0x1d6   : > { %v809_v41 = vsel %vm2408_vm5, %v1575_v54, %v1590_v8  ;;  %vm2409_vm14 = vmmov %vm2407_vm4  ;;  %v815_v6 = vsel %vm1821_vm7, %v812_v16, 0.0  ;;  %1030 = vmatpush.bf16.msrb.mxu3 %v979_v32  ;;  %v980_v25 = vpack.c.b16 %v978_v33, %v976_v13  ;;  %v796_v50 = vsel %vm1951_vm3, %v791_v29, 0.0 }
 0x1d7   : > { %v811_v42 = vsel %vm2409_vm14, %v1590_v8, %v1575_v54  ;;  %v814_v44 = vsel %vm1825_vm8, %v809_v41, 0.0  ;;  %v816_v54 = vsel %vm1825_vm8, %v810_v14, 0.0  ;;  %v797_v37 = vsel %vm1943_vm9, %v794_v55, 0.0 }
 0x1d8   : > { %v813_v53 = vsel %vm1821_vm7, %v811_v42, 0.0  ;;  %v818_v20 = vpack.c.bf16 %v816_v54, %v815_v6  ;;  %1011 = vmatpush.bf16.msrb.mxu1 %v949_v57  ;;  %v1604_v23 = vpop.permute.xlu1 %1603  ;;  %v798_v38 = vsel %vm1951_vm3, %v792_v3, 0.0  ;;  %1058 = vmatpush.bf16.msrb.mxu0 %v980_v25  ;;  %v960_v40 = vpack.c.b16 %v958_v43, %v956_v1  ;;  %v1405_v6 = vld [vmem:[%s2331_s5] sm:$0xf] }
 0x1d9   : > { %v817_v35 = vpack.c.bf16 %v814_v44, %v813_v53  ;;  %v1606_v58 = vunpack.i.h.bf16 %v1604_v23  ;;  %v1605_v24 = vunpack.i.l.bf16 %v1604_v23  ;;  %v1594_v34 = vpop.permute.xlu0 %1593  ;;  %vm2411_vm7 = vcmask 130048  }
 0x1da   : > { %1037 = vmatpush.bf16.msra.mxu3 %v970_v51  ;;  %v927_v17 = vunpack.c.l.b16 %v818_v20  ;;  %v1596_v18 = vunpack.i.h.bf16 %v1594_v34  ;;  %v1595_v28 = vunpack.i.l.bf16 %v1594_v34  ;;  %v799_v49 = vpack.c.bf16 %v796_v50, %v795_v39  ;;  %vm2417_vm2 = vmmov %vm2411_vm7 }
 0x1db   : > { %v925_v27 = vunpack.c.l.b16 %v817_v35  ;;  %1411 = vmatmul.msk.bf16.vlgmr.msrb.gmra.mxu3 %vm2411_vm7, %v2157_v62  ;;  %v800_v30 = vpack.c.bf16 %v798_v38, %v797_v37  ;;  %vm2412_vm8 = vcmp.lt.s32.totalorder %v1775_v9, 16  ;;  %v950_v57 = vpack.c.b16 %v948_v19, %v946_v2  ;;  %1412 = vmatmul.msk.bf16.vlgmr.msrb.gmra.mxu0 %vm2417_vm2, %v2157_v62  ;;  %v1068_v38 = vld [vmem:[%s2334_s8] sm:$0xf]  ;;  %vm2425_vm14 = vmmov %vm2417_vm2 }
 0x1dc   : > { %v774_v22 = vsel %vm2412_vm8, %v1596_v18, %v1606_v58  ;;  %vm2413_vm9 = vmmov %vm2412_vm8  ;;  %1012 = vmatpush.bf16.msrb.mxu1 %v2077_v56  ;;  %v926_v47 = vunpack.c.h.b16 %v817_v35  ;;  %vm2416_vm1 = vnez %v2372_v10  ;;  %v928_v48 = vunpack.c.h.b16 %v818_v20  ;;  %1071 = vperm.xlu0 %1617, %v1068_v38  }
 0x1dd   : > { %v776_v59 = vsel %vm2413_vm9, %v1606_v58, %v1596_v18  ;;  %vm2414_vm3 = vmmov %vm2412_vm8  ;;  %v929_v46 = vpack.c.b16 %v927_v17, %v925_v27  ;;  %vm2418_vm13 = vnez %v2374_v15  ;;  %v915_v2 = vunpack.c.l.b16 %v799_v49  ;;  %v995_v17 = vpop.permute.xlu2 %994 }
 0x1de   : > { %v773_v31 = vsel %vm2414_vm3, %v1595_v28, %v1605_v24  ;;  %vm2415_vm12 = vmmov %vm2414_vm3  ;;  %1038 = vmatpush.bf16.msra.mxu3 %v960_v40  ;;  %v779_v52 = vsel %vm2416_vm1, %v776_v59, 0.0  ;;  %v780_v56 = vsel %vm2418_vm13, %v774_v22, 0.0  ;;  %v917_v36 = vunpack.c.l.b16 %v800_v30 }
 0x1df   : > { %v775_v45 = vsel %vm2415_vm12, %v1605_v24, %v1595_v28  ;;  %v778_v51 = vsel %vm2418_vm13, %v773_v31, 0.0  ;;  %v782_v63 = vpack.c.bf16 %v780_v56, %v779_v52  ;;  %v1611_v7 = vunpack.i.h.bf16 %v1609_v21  ;;  %v1065_v31 = vld [vmem:[%s2333_s7] sm:$0x3]  ;;  %vm2426_vm15 = vmmov %vm2417_vm2 }
 0x1e0   : > { %v777_v0 = vsel %vm2416_vm1, %v775_v45, 0.0  ;;  %1013 = vmatpush.bf16.msrb.mxu1 %v929_v46  ;;  %v1610_v62 = vunpack.i.l.bf16 %v1609_v21  ;;  %v919_v26 = vpack.c.b16 %v917_v36, %v915_v2  ;;  %v930_v29 = vpack.c.b16 %v928_v48, %v926_v47  ;;  %v990_v34 = vpop.permute.xlu1 %989 }
 0x1e1   : > { %v781_v61 = vpack.c.bf16 %v778_v51, %v777_v0  ;;  %v1614_v1 = vpop.permute.xlu0 %1613  ;;  %v907_v10 = vunpack.c.l.b16 %v782_v63  ;;  %vm2419_vm0 = vcmp.lt.s32.totalorder %v1775_v9, 17  ;;  %vm2423_vm4 = vnez %v2380_v4  ;;  %v1436_v4 = vld [vmem:[%s2331_s5 + $0x4] sm:$0xf0] }
 0x1e2   : > { %1039 = vmatpush.bf16.msra.mxu3 %v950_v57  ;;  %v1616_v8 = vunpack.i.h.bf16 %v1614_v1  ;;  %v1615_v12 = vunpack.i.l.bf16 %v1614_v1  ;;  %vm2420_vm6 = vmmov %vm2419_vm0  ;;  %vm2424_vm5 = vnez %v2382_v11  ;;  %v916_v32 = vunpack.c.h.b16 %v799_v49  ;;  %v1437_v1 = vld [vmem:[%s2335_s9] sm:$0xff] }
 0x1e3   : > { %v905_v3 = vunpack.c.l.b16 %v781_v61  ;;  %vm2421_vm10 = vmmov %vm2419_vm0  ;;  %v918_v33 = vunpack.c.h.b16 %v800_v30  ;;  %v906_v25 = vunpack.c.h.b16 %v781_v61  ;;  %v908_v19 = vunpack.c.h.b16 %v782_v63 }
 0x1e4   : > { %v756_v15 = vsel %vm2419_vm0, %v1611_v7, %v1616_v8  ;;  %v758_v5 = vsel %vm2420_vm6, %v1616_v8, %v1611_v7  ;;  %v755_v13 = vsel %vm2421_vm10, %v1610_v62, %v1615_v12  ;;  %vm2422_vm11 = vmmov %vm2419_vm0  ;;  %1014 = vmatpush.bf16.msrb.mxu1 %v919_v26  ;;  %v1406_v35 = vor.u32 %v1436_v4, %v1405_v6 }
 0x1e5   : > { %v757_v14 = vsel %vm2422_vm11, %v1615_v12, %v1610_v62  ;;  %v760_v41 = vsel %vm2424_vm5, %v755_v13, 0.0  ;;  %v761_v42 = vsel %vm2423_vm4, %v758_v5, 0.0  ;;  %v762_v55 = vsel %vm2424_vm5, %v756_v15, 0.0  ;;  %v1119_v13 = vpop.permute.xlu2 %1118 }
 0x1e6   : > { %1040 = vmatpush.bf16.msra.mxu3 %v2079_v60  ;;  %v759_v16 = vsel %vm2423_vm4, %v757_v14, 0.0  ;;  %v764_v9 = vpack.c.bf16 %v762_v55, %v761_v42  ;;  %v909_v43 = vpack.c.b16 %v907_v10, %v905_v3  ;;  %v920_v54 = vpack.c.b16 %v918_v33, %v916_v32 }
 0x1e7   : > { %v763_v53 = vpack.c.bf16 %v760_v41, %v759_v16  ;;  %v910_v20 = vpack.c.b16 %v908_v19, %v906_v25  ;;  %vm1130_vm7 = vcmask 1041408   ;;  %vm1126_vm8 = vcmask 31744  }
 0x1e8   : > { %v897_v44 = vunpack.c.l.b16 %v764_v9  ;;  %1015 = vmatpush.bf16.msrb.mxu1 %v909_v43  ;;  %v898_v39 = vunpack.c.h.b16 %v764_v9  ;;  %v1114_v3 = vpop.permute.xlu1 %1113 }
 0x1e9   : > { %v895_v60 = vunpack.c.l.b16 %v763_v53  ;;  %v896_v23 = vunpack.c.h.b16 %v763_v53 }
 0x1ea   : > { %1041 = vmatpush.bf16.msra.mxu3 %v930_v29 }
 0x1eb   : > { %v899_v11 = vpack.c.b16 %v897_v44, %v895_v60  ;;  %v900_v50 = vpack.c.b16 %v898_v39, %v896_v23 }
 0x1ed   : > { %1016 = vmatpush.bf16.msrb.mxu1 %v899_v11 }
 0x1ee   : > { %1042 = vmatpush.bf16.msra.mxu3 %v920_v54 }
 0x1f0   : > { %1017 = vmatmul.bf16.vlgmr.msrb.gmra.mxu1 %v1406_v35 }
 0x1f2   : > { %1043 = vmatpush.bf16.msra.mxu3 %v910_v20 }
 0x1f6   : > { %1044 = vmatpush.bf16.msra.mxu3 %v900_v50 }
 0x1f9   : > { %1045 = vmatmul.bf16.vlgmr.msra.gmra.mxu3 %v1406_v35 }
 0x24e   : > { %v1072_v52 = vpop.permute.xlu0 %1071 }
 0x258   : > { %v1060_v30 = vpop.f32.mrf.mxu0 }
 0x25e   : > { %v1032_v37 = vpop.f32.mrf.mxu3 }
 0x260   : > { %v1062_v47 = vpop.f32.mrf.mxu0 }
 0x266   : > { %v1034_v24 = vpop.f32.mrf.mxu3 }
 0x26d   : > { %v1018_v58 = vpop.f32.mrf.mxu1 }
 0x26e   : > { %v1019_v27 = vadd.f32 %v1018_v58, %v990_v34 }
 0x270   : > { %v2284_v40 = vadd.f32 %v1032_v37, %v1019_v27 }
 0x275   : > { %v1020_v18 = vpop.f32.mrf.mxu1 }
 0x276   : > { %v1021_v28 = vadd.f32 %v1020_v18, %v995_v17 }
 0x278   : > { %v2286_v49 = vadd.f32 %v1034_v24, %v1021_v28 }
 0x27a   : > { %v1066_v59 = vpack.c.bf16 %v2286_v49, %v2284_v40 }
 0x27c   : > { %v1046_v22 = vpop.f32.mrf.mxu3  ;;  %1084 = vmatpush.bf16.msrb.mxu2 %v1066_v59 }
 0x27d   : > { %v1047_v45 = vadd.f32 %v1046_v22, %v990_v34 }
 0x27f   : > { %1413 = vmatmul.msk.bf16.vlgmr.msrb.gmra.mxu2 %vm2425_vm14, %v1065_v31  ;;  %v2294_v0 = vadd.f32 %v1060_v30, %v1047_v45 }
 0x284   : > { %v1048_v57 = vpop.f32.mrf.mxu3 }
 0x285   : > { %v1049_v46 = vadd.f32 %v1048_v57, %v995_v17 }
 0x287   : > { %v2296_v48 = vadd.f32 %v1062_v47, %v1049_v46 }
 0x289   : > { %v1067_v51 = vpack.c.bf16 %v2296_v48, %v2294_v0 }
 0x28b   : > { %1097 = vmatpush.bf16.msra.mxu1 %v1067_v51 }
 0x28e   : > { %1414 = vmatmul.msk.bf16.vlgmr.msra.gmra.mxu1 %vm2426_vm15, %v1065_v31 }
 0x302   : > { %v1086_v56 = vpop.f32.mrf.mxu2 }
 0x303   : > { %v1087_v21 = vadd.f32 %v1086_v56, %v1072_v52 }
 0x305   : > { %v1103_v2 = vmax.f32 %v1087_v21, 0.0 }
 0x307   : > { %v1107_v36 = vpack.c.bf16 %v1103_v2, %v1103_v2 }
 0x309   : > { %v1132_v63 = vsel %vm1130_vm7, %v1107_v36, 0 }
 0x30a   : > { %1144 = vmatpush.bf16.msra.mxu0 %v1132_v63  ;;  %v1088_v62 = vpop.f32.mrf.mxu2 }
 0x30b   : > { %v1099_v61 = vpop.f32.mrf.mxu1 }
 0x30c   : > { %v1100_v7 = vadd.f32 %v1099_v61, %v1072_v52 }
 0x30d   : > { %1419 = vmatmul.msk.bf16.vlgmr.msra.gmra.mxu0 %vm1126_vm8, %v1437_v1 }
 0x30e   : > { %v1104_v8 = vmax.f32 %v1100_v7, 0.0 }
 0x310   : > { %v1108_v12 = vpack.c.bf16 %v1104_v8, %v1104_v8 }
 0x312   : > { %v1135_v26 = vsel %vm1130_vm7, %v1108_v12, 0 }
 0x313   : > { %v1101_v29 = vpop.f32.mrf.mxu1  ;;  %1158 = vmatpush.bf16.msra.mxu2 %v1135_v26 }
 0x316   : > { %1420 = vmatmul.msk.bf16.vlgmr.msra.gmra.mxu2 %vm1126_vm8, %v1437_v1 }
 0x38a   : > { %v1146_v10 = vpop.f32.mrf.mxu0 }
 0x38b   : > { %v1147_v15 = vadd.f32 %v1146_v10, %v1114_v3 }
 0x38d   : > { %v1421_v5 = vmul.f32 -1.442695, %v1147_v15 }
 0x38f   : > { %1618 = vpow2.f32 %v1421_v5 }
 0x392   : > { %v1148_v14 = vpop.f32.mrf.mxu0 }
 0x393   : > { %v1149_v16 = vadd.f32 %v1148_v14, %v1119_v13 }
 0x395   : > { %v1619_v41 = vpop.eup %1618  ;;  %v1423_v42 = vmul.f32 -1.442695, %v1149_v16 }
 0x396   : > { %v1177_v55 = vadd.f32 1.0, %v1619_v41 }
 0x397   : > { %1620 = vpow2.f32 %v1423_v42 }
 0x398   : > { %1622 = vrcp.f32 %v1177_v55  ;;  %v1192_v11 = vand.u32 2147483648, %v1177_v55  ;;  %v1190_v35 = vand.u32 2147483647, %v1177_v55  ;;  %vm1186_vm3 = vweird.f32 %v1177_v55 }
 0x399   : > { %v1160_v32 = vpop.f32.mrf.mxu2 }
 0x39a   : > { %v1161_v33 = vadd.f32 %v1160_v32, %v1114_v3  ;;  %v1193_v37 = vor.u32 1.1754944e-38, %v1192_v11  ;;  %vm1191_vm1 = vcmp.eq.f32.partialorder %v1190_v35, 8.507059e+37 }
 0x39c   : > { %v1422_v53 = vmul.f32 -1.442695, %v1161_v33 }
 0x39d   : > { %v1621_v9 = vpop.eup %1620 }
 0x39e   : > { %1624 = vpow2.f32 %v1422_v53  ;;  %v1623_v43 = vpop.eup %1622  ;;  %v1179_v60 = vadd.f32 1.0, %v1621_v9 }
 0x39f   : > { %v1182_v44 = vmul.f32 %v1623_v43, %v1177_v55  ;;  %vm1187_vm9 = vweird.f32 %v1623_v43 }
 0x3a0   : > { %1626 = vrcp.f32 %v1179_v60  ;;  %vm1188_vm12 = vmor %vm1186_vm3, %vm1187_vm9  ;;  %v1222_v17 = vand.u32 2147483648, %v1179_v60  ;;  %v1220_v22 = vand.u32 2147483647, %v1179_v60  ;;  %vm1216_vm13 = vweird.f32 %v1179_v60 }
 0x3a1   : > { %v1162_v6 = vpop.f32.mrf.mxu2  ;;  %v1183_v4 = vsub.f32 1.0, %v1182_v44 }
 0x3a2   : > { %v1163_v54 = vadd.f32 %v1162_v6, %v1119_v13  ;;  %v1223_v46 = vor.u32 1.1754944e-38, %v1222_v17  ;;  %vm1221_vm6 = vcmp.eq.f32.partialorder %v1220_v22, 8.507059e+37 }
 0x3a3   : > { %v1184_v19 = vmul.f32 %v1623_v43, %v1183_v4 }
 0x3a4   : > { %v1625_v25 = vpop.eup %1624  ;;  %v1424_v20 = vmul.f32 -1.442695, %v1163_v54 }
 0x3a5   : > { %v1178_v23 = vadd.f32 1.0, %v1625_v25  ;;  %v1185_v39 = vadd.f32 %v1623_v43, %v1184_v19 }
 0x3a6   : > { %1628 = vpow2.f32 %v1424_v20  ;;  %v1627_v50 = vpop.eup %1626  ;;  %v1650_v20 = vld [vmem:[%s1747_s22] sm:$0xff] }
 0x3a7   : > { %1630 = vrcp.f32 %v1178_v23  ;;  %v1189_v38 = vsel %vm1188_vm12, %v1623_v43, %v1185_v39  ;;  %v1212_v58 = vmul.f32 %v1627_v50, %v1179_v60  ;;  %vm1217_vm2 = vweird.f32 %v1627_v50 }
 0x3a8   : > { %v1194_v24 = vsel %vm1191_vm1, %v1193_v37, %v1189_v38  ;;  %vm1218_vm0 = vmor %vm1216_vm13, %vm1217_vm2  ;;  %v1207_v21 = vand.u32 2147483648, %v1178_v23  ;;  %v1205_v2 = vand.u32 2147483647, %v1178_v23  ;;  %vm1201_vm11 = vweird.f32 %v1178_v23 }
 0x3a9   : > { %v1241_v34 = vmul.f32 %v1194_v24, %v2284_v40  ;;  %v1213_v27 = vsub.f32 1.0, %v1212_v58 }
 0x3aa   : > { %v1208_v8 = vor.u32 1.1754944e-38, %v1207_v21  ;;  %vm1206_vm5 = vcmp.eq.f32.partialorder %v1205_v2, 8.507059e+37  ;;  %v1652_v2 = vld [vmem:[%s1747_s22 + $0x8] sm:$0xff] }
 0x3ab   : > { %v1425_v28 = vmul.f32 -1.442695, %v1241_v34  ;;  %v1214_v30 = vmul.f32 %v1627_v50, %v1213_v27 }
 0x3ac   : > { %v1629_v18 = vpop.eup %1628 }
 0x3ad   : > { %v1631_v59 = vpop.eup %1630  ;;  %v1180_v31 = vadd.f32 1.0, %v1629_v18  ;;  %1632 = vpow2.f32 %v1425_v28  ;;  %v1215_v45 = vadd.f32 %v1627_v50, %v1214_v30 }
 0x3ae   : > { %v1197_v57 = vmul.f32 %v1631_v59, %v1178_v23  ;;  %vm1202_vm10 = vweird.f32 %v1631_v59 }
 0x3af   : > { %1634 = vrcp.f32 %v1180_v31  ;;  %v1219_v47 = vsel %vm1218_vm0, %v1627_v50, %v1215_v45  ;;  %vm1203_vm4 = vmor %vm1201_vm11, %vm1202_vm10  ;;  %v1237_v10 = vand.u32 2147483648, %v1180_v31  ;;  %v1235_v5 = vand.u32 2147483647, %v1180_v31 }
 0x3b0   : > { %v1198_v51 = vsub.f32 1.0, %v1197_v57  ;;  %v1224_v40 = vsel %vm1221_vm6, %v1223_v46, %v1219_v47  ;;  %vm1231_vm15 = vweird.f32 %v1180_v31 }
 0x3b1   : > { %v1243_v52 = vmul.f32 %v1224_v40, %v2286_v49  ;;  %v1238_v32 = vor.u32 1.1754944e-38, %v1237_v10  ;;  %vm1236_vm8 = vcmp.eq.f32.partialorder %v1235_v5, 8.507059e+37 }
 0x3b2   : > { %v1199_v56 = vmul.f32 %v1631_v59, %v1198_v51 }
 0x3b3   : > { %v1633_v36 = vpop.eup %1632  ;;  %v1427_v61 = vmul.f32 -1.442695, %v1243_v52 }
 0x3b4   : > { %v1200_v63 = vadd.f32 %v1631_v59, %v1199_v56  ;;  %v1257_v7 = vadd.f32 1.0, %v1633_v36 }
 0x3b5   : > { %v1635_v1 = vpop.eup %1634  ;;  %1636 = vpow2.f32 %v1427_v61 }
 0x3b6   : > { %v1204_v62 = vsel %vm1203_vm4, %v1631_v59, %v1200_v63  ;;  %v1227_v12 = vmul.f32 %v1635_v1, %v1180_v31  ;;  %1638 = vrcp.f32 %v1257_v7  ;;  %vm1232_vm14 = vweird.f32 %v1635_v1  ;;  %v1651_v59 = vld [vmem:[%s1747_s22 + $0x10] sm:$0xff] }
 0x3b7   : > { %v1209_v26 = vsel %vm1206_vm5, %v1208_v8, %v1204_v62  ;;  %vm1233_vm7 = vmor %vm1231_vm15, %vm1232_vm14  ;;  %v1270_v60 = vand.u32 2147483647, %v1257_v7  ;;  %vm1266_vm3 = vweird.f32 %v1257_v7 }
 0x3b8   : > { %v1228_v29 = vsub.f32 1.0, %v1227_v12  ;;  %v1242_v49 = vmul.f32 %v1209_v26, %v2294_v0  ;;  %v1272_v0 = vand.u32 2147483648, %v1257_v7 }
 0x3b9   : > { %vm1271_vm1 = vcmp.eq.f32.partialorder %v1270_v60, 8.507059e+37 }
 0x3ba   : > { %v1229_v3 = vmul.f32 %v1635_v1, %v1228_v29  ;;  %v1426_v15 = vmul.f32 -1.442695, %v1242_v49  ;;  %v1273_v25 = vor.u32 1.1754944e-38, %v1272_v0  ;;  %v1653_v29 = vld [vmem:[%s1747_s22 + $0x18] sm:$0xff] }
 0x3bb   : > { %v1637_v13 = vpop.eup %1636 }
 0x3bc   : > { %v1230_v14 = vadd.f32 %v1635_v1, %v1229_v3  ;;  %v1639_v16 = vpop.eup %1638  ;;  %v1259_v41 = vadd.f32 1.0, %v1637_v13  ;;  %1640 = vpow2.f32 %v1426_v15 }
 0x3bd   : > { %v1262_v42 = vmul.f32 %v1639_v16, %v1257_v7  ;;  %vm1267_vm9 = vweird.f32 %v1639_v16 }
 0x3be   : > { %v1234_v55 = vsel %vm1233_vm7, %v1635_v1, %v1230_v14  ;;  %1642 = vrcp.f32 %v1259_v41  ;;  %vm1268_vm12 = vmor %vm1266_vm3, %vm1267_vm9  ;;  %v1302_v50 = vand.u32 2147483648, %v1259_v41  ;;  %v1300_v38 = vand.u32 2147483647, %v1259_v41 }
 0x3bf   : > { %v1263_v33 = vsub.f32 1.0, %v1262_v42  ;;  %v1239_v53 = vsel %vm1236_vm8, %v1238_v32, %v1234_v55  ;;  %vm1296_vm13 = vweird.f32 %v1259_v41 }
 0x3c0   : > { %v1244_v9 = vmul.f32 %v1239_v53, %v2296_v48  ;;  %v1303_v17 = vor.u32 1.1754944e-38, %v1302_v50  ;;  %vm1301_vm6 = vcmp.eq.f32.partialorder %v1300_v38, 8.507059e+37 }
 0x3c1   : > { %v1264_v43 = vmul.f32 %v1639_v16, %v1263_v33 }
 0x3c2   : > { %v1641_v44 = vpop.eup %1640  ;;  %v1428_v6 = vmul.f32 -1.442695, %v1244_v9 }
 0x3c3   : > { %v1265_v4 = vadd.f32 %v1639_v16, %v1264_v43  ;;  %v1258_v54 = vadd.f32 1.0, %v1641_v44 }
 0x3c4   : > { %v1643_v11 = vpop.eup %1642  ;;  %1644 = vpow2.f32 %v1428_v6 }
 0x3c5   : > { %v1269_v19 = vsel %vm1268_vm12, %v1639_v16, %v1265_v4  ;;  %v1292_v35 = vmul.f32 %v1643_v11, %v1259_v41  ;;  %1646 = vrcp.f32 %v1258_v54  ;;  %vm1297_vm2 = vweird.f32 %v1643_v11 }
 0x3c6   : > { %v1274_v48 = vsel %vm1271_vm1, %v1273_v25, %v1269_v19  ;;  %vm1298_vm0 = vmor %vm1296_vm13, %vm1297_vm2  ;;  %v1287_v45 = vand.u32 2147483648, %v1258_v54  ;;  %v1285_v46 = vand.u32 2147483647, %v1258_v54  ;;  %vm1281_vm11 = vweird.f32 %v1258_v54 }
 0x3c7   : > { %v1321_v23 = vmul.f32 %v1650_v20, %v1274_v48  ;;  %v1293_v39 = vsub.f32 1.0, %v1292_v35 }
 0x3c8   : > { %v1288_v40 = vor.u32 1.1754944e-38, %v1287_v45  ;;  %vm1286_vm5 = vcmp.eq.f32.partialorder %v1285_v46, 8.507059e+37 }
 0x3c9   : > { %1325 = vst [vmem:[%s2313_s29] sm:$0xff] %v1321_v23  ;;  %v1294_v37 = vmul.f32 %v1643_v11, %v1293_v39 }
 0x3ca   : > { %v1645_v58 = vpop.eup %1644 }
 0x3cb   : > { %v1647_v24 = vpop.eup %1646  ;;  %v1295_v34 = vadd.f32 %v1643_v11, %v1294_v37  ;;  %v1260_v27 = vadd.f32 1.0, %v1645_v58 }
 0x3cc   : > { %v1277_v18 = vmul.f32 %v1647_v24, %v1258_v54  ;;  %vm1282_vm10 = vweird.f32 %v1647_v24 }
 0x3cd   : > { %v1299_v28 = vsel %vm1298_vm0, %v1643_v11, %v1295_v34  ;;  %1648 = vrcp.f32 %v1260_v27  ;;  %vm1283_vm4 = vmor %vm1281_vm11, %vm1282_vm10  ;;  %v1317_v63 = vand.u32 2147483648, %v1260_v27  ;;  %v1315_v7 = vand.u32 2147483647, %v1260_v27 }
 0x3ce   : > { %v1304_v30 = vsel %vm1301_vm6, %v1303_v17, %v1299_v28  ;;  %v1278_v22 = vsub.f32 1.0, %v1277_v18  ;;  %vm1311_vm15 = vweird.f32 %v1260_v27 }
 0x3cf   : > { %v1323_v31 = vmul.f32 %v1651_v59, %v1304_v30  ;;  %v1318_v8 = vor.u32 1.1754944e-38, %v1317_v63  ;;  %vm1316_vm8 = vcmp.eq.f32.partialorder %v1315_v7, 8.507059e+37 }
 0x3d0   : > { %v1279_v57 = vmul.f32 %v1647_v24, %v1278_v22 }
 0x3d1   : > { %1327 = vst [vmem:[%s2313_s29 + $0x10] sm:$0xff] %v1323_v31 }
 0x3d2   : > { %v1280_v47 = vadd.f32 %v1647_v24, %v1279_v57 }
 0x3d3   : > { %v1649_v51 = vpop.eup %1648 }
 0x3d4   : > { %v1284_v52 = vsel %vm1283_vm4, %v1647_v24, %v1280_v47  ;;  %v1307_v56 = vmul.f32 %v1649_v51, %v1260_v27  ;;  %vm1312_vm14 = vweird.f32 %v1649_v51 }
 0x3d5   : > { %v1289_v21 = vsel %vm1286_vm5, %v1288_v40, %v1284_v52  ;;  %vm1313_vm7 = vmor %vm1311_vm15, %vm1312_vm14 }
 0x3d6   : > { %v1322_v36 = vmul.f32 %v1652_v2, %v1289_v21  ;;  %v1308_v61 = vsub.f32 1.0, %v1307_v56 }
 0x3d8   : > { %1326 = vst [vmem:[%s2313_s29 + $0x8] sm:$0xff] %v1322_v36  ;;  %v1309_v1 = vmul.f32 %v1649_v51, %v1308_v61 }
 0x3da   : > { %v1310_v62 = vadd.f32 %v1649_v51, %v1309_v1 }
 0x3dc   : > { %v1314_v12 = vsel %vm1313_vm7, %v1649_v51, %v1310_v62 }
 0x3dd   : > { %v1319_v26 = vsel %vm1316_vm8, %v1318_v8, %v1314_v12 }
 0x3de   : > { %v1324_v49 = vmul.f32 %v1653_v29, %v1319_v26 }
 0x3e0   : > { %1328 = vst [vmem:[%s2313_s29 + $0x18] sm:$0xff] %v1324_v49 }
 0x3e1 PF: > { %s21_s17 = sadd.s32 1, %s1660_s17  }
 0x3e2   : > { %p18_p4 = scmp.ge.s32.totalorder %s21_s17, 4  }
 0x3e4   :  { %20 = sbr.rel (!%p18_p4) target bundleno = 1 (0x1), region = 94 }

</bundles_post_ra>
